<compile_context>
chip_gen: v5e
topology: v5e:2x2
jax: 0.10.0
libtpu: 0.0.40
codegen_flags: <defaults>
</compile_context>

<pallas_src>
import jax
import jax.numpy as jnp
from jax import lax
from jax.experimental import pallas as pl
from jax.experimental.pallas import tpu as pltpu

# ----------------------------------------------------------------------------
# Model hyper-parameters (small, consistent with the module's __init__)
# ----------------------------------------------------------------------------
PRETRAINED_DIM = 32        # config.model.pretrained_dim  (mlp_input_dim)
HID1, HID2, HID3 = 512, 256, 256
NUM_FINE_CLASSES = 16      # train_ds.num_fine_classes
NUM_COARSE_CLASSES = 8     # train_ds.num_coarse_classes
BATCH = 8
LN_EPS = 1e-5
OUT_PAD = 128              # lane-dense merged logits slab (fine 0:16, coarse 16:24)

# ---- layout of the packed small-parameter f32 slab (one row) -----------------
# per-head segment: b1(512) g1(512) be1(512) b2(256) g2(256) be2(256)
#                   b3(256) g3(256) be3(256)        = 3072 lanes (all 128-aligned)
_OFF_B1 = 0
_OFF_G1 = HID1
_OFF_BE1 = 2 * HID1
_OFF_B2 = 3 * HID1
_OFF_G2 = _OFF_B2 + HID2
_OFF_BE2 = _OFF_G2 + HID2
_OFF_B3 = _OFF_BE2 + HID2
_OFF_G3 = _OFF_B3 + HID3
_OFF_BE3 = _OFF_G3 + HID3
_HEAD_SLAB = _OFF_BE3 + HID3          # 3072
_OFF_B4BLK = 2 * _HEAD_SLAB           # 6144  (shared, padded final bias)
_SLAB_LEN = _OFF_B4BLK + OUT_PAD      # 6272


# ----------------------------------------------------------------------------
# In-kernel math
# ----------------------------------------------------------------------------
def _layernorm(h, gamma, beta):
    # single-pass statistics: sum and sum-of-squares issue as independent
    # lane reductions (better ILP than mean -> center -> mean-of-squares)
    d_inv = 1.0 / h.shape[-1]
    s1 = jnp.sum(h, axis=-1, keepdims=True)
    s2 = jnp.sum(h * h, axis=-1, keepdims=True)
    mu = s1 * d_inv
    var = s2 * d_inv - mu * mu
    inv = lax.rsqrt(var + LN_EPS)
    return (h - mu) * inv * gamma + beta


def _head_tail(h1_part, slab_ref, base, w2_ref, w3_ref):
    """Layers after the fused first matmul for one head:
       (+b1)->LN->ReLU->Linear->LN->ReLU->Linear->LN->ReLU  (Dropout = id)."""
    def sl(off, n):
        return slab_ref[:, base + off: base + off + n]

    h = h1_part + sl(_OFF_B1, HID1)
    h = jnp.maximum(_layernorm(h, sl(_OFF_G1, HID1), sl(_OFF_BE1, HID1)), 0.0)
    # lazy weight loads: upcast bf16 -> f32 at the point of use only
    h = jnp.dot(h, w2_ref[...].astype(jnp.float32),
                preferred_element_type=jnp.float32) + sl(_OFF_B2, HID2)
    h = jnp.maximum(_layernorm(h, sl(_OFF_G2, HID2), sl(_OFF_BE2, HID2)), 0.0)
    h = jnp.dot(h, w3_ref[...].astype(jnp.float32),
                preferred_element_type=jnp.float32) + sl(_OFF_B3, HID3)
    h = jnp.maximum(_layernorm(h, sl(_OFF_G3, HID3), sl(_OFF_BE3, HID3)), 0.0)
    return h


def _agg_kernel(x_ref, w1cat_ref, w2f_ref, w3f_ref, w2c_ref, w3c_ref,
                w4blk_ref, slab_ref, out_ref):
    # video_transformer is nn.Identity() (pretrained path): fts = x
    x = x_ref[...].astype(jnp.float32)

    # Fused first layer of BOTH heads: (bm, 32) @ (32, 1024) on the MXU.
    h1 = jnp.dot(x, w1cat_ref[...].astype(jnp.float32),
                 preferred_element_type=jnp.float32)

    h3_fine = _head_tail(h1[:, :HID1], slab_ref, 0, w2f_ref, w3f_ref)
    h3_coarse = _head_tail(h1[:, HID1:], slab_ref, _HEAD_SLAB, w2c_ref, w3c_ref)

    # Fused final layer via a block-diagonal W4: one matmul, one lane-dense
    # unmasked (bm, 128) store (fine logits in lanes 0:16, coarse in 16:24).
    h3 = jnp.concatenate([h3_fine, h3_coarse], axis=-1)          # (bm, 512)
    out = jnp.dot(h3, w4blk_ref[...].astype(jnp.float32),
                  preferred_element_type=jnp.float32)
    out_ref[...] = out + slab_ref[:, _OFF_B4BLK:_OFF_B4BLK + OUT_PAD]


# ----------------------------------------------------------------------------
# Wrapper
# ----------------------------------------------------------------------------
@jax.jit
def aggregation_transformer(x, w1cat, w2f, w3f, w2c, w3c, w4blk, slab):
    B = x.shape[0]
    # Batch tiling: weights use constant index_maps so they stay VMEM-resident
    # across batch tiles; the batch axis is "parallel" (sharded on v7x's 2 TCs).
    bm = 128 if (B % 128 == 0) else B
    grid = (B // bm,)
    const = lambda i: (0, 0)

    out = pl.pallas_call(
        _agg_kernel,
        out_shape=jax.ShapeDtypeStruct((B, OUT_PAD), jnp.float32),
        grid=grid,
        in_specs=[
            pl.BlockSpec((bm, PRETRAINED_DIM), lambda i: (i, 0)),   # x
            pl.BlockSpec((PRETRAINED_DIM, 2 * HID1), const),        # W1 fine|coarse
            pl.BlockSpec((HID1, HID2), const),                      # W2 fine
            pl.BlockSpec((HID2, HID3), const),                      # W3 fine
            pl.BlockSpec((HID1, HID2), const),                      # W2 coarse
            pl.BlockSpec((HID2, HID3), const),                      # W3 coarse
            pl.BlockSpec((2 * HID3, OUT_PAD), const),               # W4 block-diag
            pl.BlockSpec((1, _SLAB_LEN), const),                    # packed small params
        ],
        out_specs=pl.BlockSpec((bm, OUT_PAD), lambda i: (i, 0)),
        compiler_params=pltpu.CompilerParams(
            dimension_semantics=("parallel",)),
    )(x, w1cat, w2f, w3f, w2c, w3c, w4blk, slab)

    fine = out[:, :NUM_FINE_CLASSES]
    coarse = out[:, NUM_FINE_CLASSES:NUM_FINE_CLASSES + NUM_COARSE_CLASSES]
    return coarse, fine   # same ordering as the PyTorch module


# ----------------------------------------------------------------------------
# Deterministic parameter construction (synthetic, mimics torch defaults)
# ----------------------------------------------------------------------------
def _make_head_params(key, in_dim, num_classes):
    dims = [(in_dim, HID1), (HID1, HID2), (HID2, HID3), (HID3, num_classes)]
    keys = jax.random.split(key, 8)
    params = []
    for i, (din, dout) in enumerate(dims):
        bound = 1.0 / jnp.sqrt(jnp.float32(din))
        w = jax.random.uniform(keys[2 * i], (din, dout), jnp.float32, -bound, bound)
        b = jax.random.uniform(keys[2 * i + 1], (1, dout), jnp.float32, -bound, bound)
        # weights in bf16 (HBM-bound kernel -> halve weight DMA); biases/LN in f32
        params.extend([w.astype(jnp.bfloat16), b])
        if i < 3:
            params.extend([jnp.ones((1, dout), jnp.float32),     # LN gamma
                           jnp.zeros((1, dout), jnp.float32)])   # LN beta
    return tuple(params)


def _pack_inputs(fine_params, coarse_params):
    """Pack per-head params into the kernel's 7 fused inputs (done once)."""
    (w1f, b1f, g1f, be1f, w2f, b2f, g2f, be2f,
     w3f, b3f, g3f, be3f, w4f, b4f) = fine_params
    (w1c, b1c, g1c, be1c, w2c, b2c, g2c, be2c,
     w3c, b3c, g3c, be3c, w4c, b4c) = coarse_params

    w1cat = jnp.concatenate([w1f, w1c], axis=1)                       # (32, 1024) bf16

    w4blk = jnp.zeros((2 * HID3, OUT_PAD), jnp.bfloat16)              # (512, 128) bf16
    w4blk = w4blk.at[:HID3, :NUM_FINE_CLASSES].set(w4f)
    w4blk = w4blk.at[HID3:, NUM_FINE_CLASSES:
                     NUM_FINE_CLASSES + NUM_COARSE_CLASSES].set(w4c)

    b4blk = jnp.zeros((1, OUT_PAD), jnp.float32)
    b4blk = b4blk.at[:, :NUM_FINE_CLASSES].set(b4f)
    b4blk = b4blk.at[:, NUM_FINE_CLASSES:
                     NUM_FINE_CLASSES + NUM_COARSE_CLASSES].set(b4c)

    def head_slab(b1, g1, be1, b2, g2, be2, b3, g3, be3):
        return jnp.concatenate([b1, g1, be1, b2, g2, be2, b3, g3, be3], axis=1)

    slab = jnp.concatenate(
        [head_slab(b1f, g1f, be1f, b2f, g2f, be2f, b3f, g3f, be3f),
         head_slab(b1c, g1c, be1c, b2c, g2c, be2c, b3c, g3c, be3c),
         b4blk], axis=1).astype(jnp.float32)                          # (1, 6272) f32

    return (w1cat, w2f, w3f, w2c, w3c, w4blk, slab)


# ----------------------------------------------------------------------------
# Pure-JAX reference (for correctness checking; matches PyTorch semantics)
# ----------------------------------------------------------------------------
def _ref_head(x, p):
    w1, b1, g1, be1, w2, b2, g2, be2, w3, b3, g3, be3, w4, b4 = (
        a.astype(jnp.float32) for a in p)

    def ln(h, g, b):
        mu = h.mean(-1, keepdims=True)
        var = ((h - mu) ** 2).mean(-1, keepdims=True)
        return (h - mu) / jnp.sqrt(var + LN_EPS) * g + b

    h = jnp.maximum(ln(x @ w1 + b1, g1, be1), 0.0)
    h = jnp.maximum(ln(h @ w2 + b2, g2, be2), 0.0)
    h = jnp.maximum(ln(h @ w3 + b3, g3, be3), 0.0)
    return h @ w4 + b4


if __name__ == "__main__":
    # TODO(synk): VideoTransformer branch (pretrained=False) not implemented;
    # this module instance uses the pretrained/Identity path per the spec.
    root = jax.random.PRNGKey(0)
    k_x, k_fine, k_coarse = jax.random.split(root, 3)

    x = jax.random.normal(k_x, (BATCH, PRETRAINED_DIM), jnp.float32)
    fine_params = _make_head_params(k_fine, PRETRAINED_DIM, NUM_FINE_CLASSES)
    coarse_params = _make_head_params(k_coarse, PRETRAINED_DIM, NUM_COARSE_CLASSES)

    packed = _pack_inputs(fine_params, coarse_params)   # done once per model
    coarse, fine = aggregation_transformer(x, *packed)
    jax.block_until_ready((coarse, fine))

    # sanity-check against pure-JAX reference
    fine_ref = _ref_head(x, fine_params)
    coarse_ref = _ref_head(x, coarse_params)
    assert fine.shape == (BATCH, NUM_FINE_CLASSES)
    assert coarse.shape == (BATCH, NUM_COARSE_CLASSES)
    assert jnp.allclose(fine, fine_ref, atol=2e-4, rtol=2e-4)
    assert jnp.allclose(coarse, coarse_ref, atol=2e-4, rtol=2e-4)

    print("KERNEL_OK")
</pallas_src>

<mosaic_0001>
module attributes {stable_mosaic.version = 11 : i64} {
  func.func @_agg_kernel(%arg0: i32, %arg1: memref<8x32xf32, #tpu.memory_space<vmem>>, %arg2: memref<32x1024xbf16, #tpu.memory_space<vmem>>, %arg3: memref<512x256xbf16, #tpu.memory_space<vmem>>, %arg4: memref<256x256xbf16, #tpu.memory_space<vmem>>, %arg5: memref<512x256xbf16, #tpu.memory_space<vmem>>, %arg6: memref<256x256xbf16, #tpu.memory_space<vmem>>, %arg7: memref<512x128xbf16, #tpu.memory_space<vmem>>, %arg8: memref<1x6272xf32, #tpu.memory_space<vmem>>, %arg9: memref<8x128xf32, #tpu.memory_space<vmem>>) attributes {dimension_semantics = [#tpu.dimension_semantics<parallel>], iteration_bounds = array<i64: 1>, scalar_prefetch = 0 : i64, scratch_operands = 0 : i64, tpu.core_type = #tpu.core_type<tc>, window_params = [{transform_indices = @transform_0, window_bounds = array<i64: 8, 32>}, {pipeline_mode = #tpu.pipeline_mode<synchronous>, transform_indices = @transform_1, window_bounds = array<i64: 32, 1024>}, {pipeline_mode = #tpu.pipeline_mode<synchronous>, transform_indices = @transform_2, window_bounds = array<i64: 512, 256>}, {pipeline_mode = #tpu.pipeline_mode<synchronous>, transform_indices = @transform_3, window_bounds = array<i64: 256, 256>}, {pipeline_mode = #tpu.pipeline_mode<synchronous>, transform_indices = @transform_4, window_bounds = array<i64: 512, 256>}, {pipeline_mode = #tpu.pipeline_mode<synchronous>, transform_indices = @transform_5, window_bounds = array<i64: 256, 256>}, {pipeline_mode = #tpu.pipeline_mode<synchronous>, transform_indices = @transform_6, window_bounds = array<i64: 512, 128>}, {pipeline_mode = #tpu.pipeline_mode<synchronous>, transform_indices = @transform_7, window_bounds = array<i64: 1, 6272>}, {transform_indices = @transform_8, window_bounds = array<i64: 8, 128>}]} {
    %c0 = arith.constant 0 : index
    %c0_0 = arith.constant 0 : index
    %0 = vector.load %arg1[%c0, %c0_0] : memref<8x32xf32, #tpu.memory_space<vmem>>, vector<8x32xf32>
    %c0_1 = arith.constant 0 : index
    %c0_2 = arith.constant 0 : index
    %1 = vector.load %arg2[%c0_1, %c0_2] : memref<32x1024xbf16, #tpu.memory_space<vmem>>, vector<32x1024xbf16>
    %2 = arith.extf %1 : vector<32x1024xbf16> to vector<32x1024xf32>
    %cst = arith.constant dense<0.000000e+00> : vector<8x1024xf32>
    %3 = tpu.matmul %0, %2, %cst {dimension_numbers = #tpu.dot_dimension_numbers<[1], [0], [0], [1], [0, 0, 1, 1], [], []>} : vector<8x32xf32>, vector<32x1024xf32>, vector<8x1024xf32> -> vector<8x1024xf32>
    %4 = vector.extract_strided_slice %3 {offsets = [0, 0], sizes = [8, 512], strides = [1, 1]} : vector<8x1024xf32> to vector<8x512xf32>
    %c0_3 = arith.constant 0 : index
    %c0_4 = arith.constant 0 : index
    %5 = vector.load %arg8[%c0_3, %c0_4] : memref<1x6272xf32, #tpu.memory_space<vmem>>, vector<1x512xf32>
    %6 = vector.broadcast %5 : vector<1x512xf32> to vector<8x512xf32>
    %7 = arith.addf %4, %6 : vector<8x512xf32>
    %c0_5 = arith.constant 0 : index
    %c512 = arith.constant 512 : index
    %8 = vector.load %arg8[%c0_5, %c512] : memref<1x6272xf32, #tpu.memory_space<vmem>>, vector<1x512xf32>
    %c0_6 = arith.constant 0 : index
    %c1024 = arith.constant 1024 : index
    %9 = vector.load %arg8[%c0_6, %c1024] : memref<1x6272xf32, #tpu.memory_space<vmem>>, vector<1x512xf32>
    %cst_7 = arith.constant dense<0.000000e+00> : vector<8xf32>
    %10 = vector.multi_reduction <add>, %7, %cst_7 [1] : vector<8x512xf32> to vector<8xf32>
    %11 = vector.shape_cast %10 : vector<8xf32> to vector<8x1xf32>
    %12 = arith.mulf %7, %7 : vector<8x512xf32>
    %cst_8 = arith.constant dense<0.000000e+00> : vector<8xf32>
    %13 = vector.multi_reduction <add>, %12, %cst_8 [1] : vector<8x512xf32> to vector<8xf32>
    %14 = vector.shape_cast %13 : vector<8xf32> to vector<8x1xf32>
    %cst_9 = arith.constant 0.001953125 : f32
    %15 = vector.broadcast %cst_9 : f32 to vector<8x1xf32>
    %16 = arith.mulf %11, %15 : vector<8x1xf32>
    %cst_10 = arith.constant 0.001953125 : f32
    %17 = vector.broadcast %cst_10 : f32 to vector<8x1xf32>
    %18 = arith.mulf %14, %17 : vector<8x1xf32>
    %19 = arith.mulf %16, %16 : vector<8x1xf32>
    %20 = arith.subf %18, %19 : vector<8x1xf32>
    %cst_11 = arith.constant 9.99999974E-6 : f32
    %21 = vector.broadcast %cst_11 : f32 to vector<8x1xf32>
    %22 = arith.addf %20, %21 : vector<8x1xf32>
    %23 = math.rsqrt %22 : vector<8x1xf32>
    %24 = vector.broadcast %16 : vector<8x1xf32> to vector<8x512xf32>
    %25 = arith.subf %7, %24 : vector<8x512xf32>
    %26 = vector.broadcast %23 : vector<8x1xf32> to vector<8x512xf32>
    %27 = arith.mulf %25, %26 : vector<8x512xf32>
    %28 = vector.broadcast %8 : vector<1x512xf32> to vector<8x512xf32>
    %29 = arith.mulf %27, %28 : vector<8x512xf32>
    %30 = vector.broadcast %9 : vector<1x512xf32> to vector<8x512xf32>
    %31 = arith.addf %29, %30 : vector<8x512xf32>
    %cst_12 = arith.constant 0.000000e+00 : f32
    %32 = vector.broadcast %cst_12 : f32 to vector<8x512xf32>
    %33 = arith.maximumf %31, %32 : vector<8x512xf32>
    %c0_13 = arith.constant 0 : index
    %c0_14 = arith.constant 0 : index
    %34 = vector.load %arg3[%c0_13, %c0_14] : memref<512x256xbf16, #tpu.memory_space<vmem>>, vector<512x256xbf16>
    %35 = arith.extf %34 : vector<512x256xbf16> to vector<512x256xf32>
    %cst_15 = arith.constant dense<0.000000e+00> : vector<8x256xf32>
    %36 = tpu.matmul %33, %35, %cst_15 {dimension_numbers = #tpu.dot_dimension_numbers<[1], [0], [0], [1], [0, 0, 1, 1], [], []>} : vector<8x512xf32>, vector<512x256xf32>, vector<8x256xf32> -> vector<8x256xf32>
    %c0_16 = arith.constant 0 : index
    %c1536 = arith.constant 1536 : index
    %37 = vector.load %arg8[%c0_16, %c1536] : memref<1x6272xf32, #tpu.memory_space<vmem>>, vector<1x256xf32>
    %38 = vector.broadcast %37 : vector<1x256xf32> to vector<8x256xf32>
    %39 = arith.addf %36, %38 : vector<8x256xf32>
    %c0_17 = arith.constant 0 : index
    %c1792 = arith.constant 1792 : index
    %40 = vector.load %arg8[%c0_17, %c1792] : memref<1x6272xf32, #tpu.memory_space<vmem>>, vector<1x256xf32>
    %c0_18 = arith.constant 0 : index
    %c2048 = arith.constant 2048 : index
    %41 = vector.load %arg8[%c0_18, %c2048] : memref<1x6272xf32, #tpu.memory_space<vmem>>, vector<1x256xf32>
    %cst_19 = arith.constant dense<0.000000e+00> : vector<8xf32>
    %42 = vector.multi_reduction <add>, %39, %cst_19 [1] : vector<8x256xf32> to vector<8xf32>
    %43 = vector.shape_cast %42 : vector<8xf32> to vector<8x1xf32>
    %44 = arith.mulf %39, %39 : vector<8x256xf32>
    %cst_20 = arith.constant dense<0.000000e+00> : vector<8xf32>
    %45 = vector.multi_reduction <add>, %44, %cst_20 [1] : vector<8x256xf32> to vector<8xf32>
    %46 = vector.shape_cast %45 : vector<8xf32> to vector<8x1xf32>
    %cst_21 = arith.constant 3.906250e-03 : f32
    %47 = vector.broadcast %cst_21 : f32 to vector<8x1xf32>
    %48 = arith.mulf %43, %47 : vector<8x1xf32>
    %cst_22 = arith.constant 3.906250e-03 : f32
    %49 = vector.broadcast %cst_22 : f32 to vector<8x1xf32>
    %50 = arith.mulf %46, %49 : vector<8x1xf32>
    %51 = arith.mulf %48, %48 : vector<8x1xf32>
    %52 = arith.subf %50, %51 : vector<8x1xf32>
    %cst_23 = arith.constant 9.99999974E-6 : f32
    %53 = vector.broadcast %cst_23 : f32 to vector<8x1xf32>
    %54 = arith.addf %52, %53 : vector<8x1xf32>
    %55 = math.rsqrt %54 : vector<8x1xf32>
    %56 = vector.broadcast %48 : vector<8x1xf32> to vector<8x256xf32>
    %57 = arith.subf %39, %56 : vector<8x256xf32>
    %58 = vector.broadcast %55 : vector<8x1xf32> to vector<8x256xf32>
    %59 = arith.mulf %57, %58 : vector<8x256xf32>
    %60 = vector.broadcast %40 : vector<1x256xf32> to vector<8x256xf32>
    %61 = arith.mulf %59, %60 : vector<8x256xf32>
    %62 = vector.broadcast %41 : vector<1x256xf32> to vector<8x256xf32>
    %63 = arith.addf %61, %62 : vector<8x256xf32>
    %cst_24 = arith.constant 0.000000e+00 : f32
    %64 = vector.broadcast %cst_24 : f32 to vector<8x256xf32>
    %65 = arith.maximumf %63, %64 : vector<8x256xf32>
    %c0_25 = arith.constant 0 : index
    %c0_26 = arith.constant 0 : index
    %66 = vector.load %arg4[%c0_25, %c0_26] : memref<256x256xbf16, #tpu.memory_space<vmem>>, vector<256x256xbf16>
    %67 = arith.extf %66 : vector<256x256xbf16> to vector<256x256xf32>
    %cst_27 = arith.constant dense<0.000000e+00> : vector<8x256xf32>
    %68 = tpu.matmul %65, %67, %cst_27 {dimension_numbers = #tpu.dot_dimension_numbers<[1], [0], [0], [1], [0, 0, 1, 1], [], []>} : vector<8x256xf32>, vector<256x256xf32>, vector<8x256xf32> -> vector<8x256xf32>
    %c0_28 = arith.constant 0 : index
    %c2304 = arith.constant 2304 : index
    %69 = vector.load %arg8[%c0_28, %c2304] : memref<1x6272xf32, #tpu.memory_space<vmem>>, vector<1x256xf32>
    %70 = vector.broadcast %69 : vector<1x256xf32> to vector<8x256xf32>
    %71 = arith.addf %68, %70 : vector<8x256xf32>
    %c0_29 = arith.constant 0 : index
    %c2560 = arith.constant 2560 : index
    %72 = vector.load %arg8[%c0_29, %c2560] : memref<1x6272xf32, #tpu.memory_space<vmem>>, vector<1x256xf32>
    %c0_30 = arith.constant 0 : index
    %c2816 = arith.constant 2816 : index
    %73 = vector.load %arg8[%c0_30, %c2816] : memref<1x6272xf32, #tpu.memory_space<vmem>>, vector<1x256xf32>
    %cst_31 = arith.constant dense<0.000000e+00> : vector<8xf32>
    %74 = vector.multi_reduction <add>, %71, %cst_31 [1] : vector<8x256xf32> to vector<8xf32>
    %75 = vector.shape_cast %74 : vector<8xf32> to vector<8x1xf32>
    %76 = arith.mulf %71, %71 : vector<8x256xf32>
    %cst_32 = arith.constant dense<0.000000e+00> : vector<8xf32>
    %77 = vector.multi_reduction <add>, %76, %cst_32 [1] : vector<8x256xf32> to vector<8xf32>
    %78 = vector.shape_cast %77 : vector<8xf32> to vector<8x1xf32>
    %cst_33 = arith.constant 3.906250e-03 : f32
    %79 = vector.broadcast %cst_33 : f32 to vector<8x1xf32>
    %80 = arith.mulf %75, %79 : vector<8x1xf32>
    %cst_34 = arith.constant 3.906250e-03 : f32
    %81 = vector.broadcast %cst_34 : f32 to vector<8x1xf32>
    %82 = arith.mulf %78, %81 : vector<8x1xf32>
    %83 = arith.mulf %80, %80 : vector<8x1xf32>
    %84 = arith.subf %82, %83 : vector<8x1xf32>
    %cst_35 = arith.constant 9.99999974E-6 : f32
    %85 = vector.broadcast %cst_35 : f32 to vector<8x1xf32>
    %86 = arith.addf %84, %85 : vector<8x1xf32>
    %87 = math.rsqrt %86 : vector<8x1xf32>
    %88 = vector.broadcast %80 : vector<8x1xf32> to vector<8x256xf32>
    %89 = arith.subf %71, %88 : vector<8x256xf32>
    %90 = vector.broadcast %87 : vector<8x1xf32> to vector<8x256xf32>
    %91 = arith.mulf %89, %90 : vector<8x256xf32>
    %92 = vector.broadcast %72 : vector<1x256xf32> to vector<8x256xf32>
    %93 = arith.mulf %91, %92 : vector<8x256xf32>
    %94 = vector.broadcast %73 : vector<1x256xf32> to vector<8x256xf32>
    %95 = arith.addf %93, %94 : vector<8x256xf32>
    %cst_36 = arith.constant 0.000000e+00 : f32
    %96 = vector.broadcast %cst_36 : f32 to vector<8x256xf32>
    %97 = arith.maximumf %95, %96 : vector<8x256xf32>
    %98 = vector.extract_strided_slice %3 {offsets = [0, 512], sizes = [8, 512], strides = [1, 1]} : vector<8x1024xf32> to vector<8x512xf32>
    %c0_37 = arith.constant 0 : index
    %c3072 = arith.constant 3072 : index
    %99 = vector.load %arg8[%c0_37, %c3072] : memref<1x6272xf32, #tpu.memory_space<vmem>>, vector<1x512xf32>
    %100 = vector.broadcast %99 : vector<1x512xf32> to vector<8x512xf32>
    %101 = arith.addf %98, %100 : vector<8x512xf32>
    %c0_38 = arith.constant 0 : index
    %c3584 = arith.constant 3584 : index
    %102 = vector.load %arg8[%c0_38, %c3584] : memref<1x6272xf32, #tpu.memory_space<vmem>>, vector<1x512xf32>
    %c0_39 = arith.constant 0 : index
    %c4096 = arith.constant 4096 : index
    %103 = vector.load %arg8[%c0_39, %c4096] : memref<1x6272xf32, #tpu.memory_space<vmem>>, vector<1x512xf32>
    %cst_40 = arith.constant dense<0.000000e+00> : vector<8xf32>
    %104 = vector.multi_reduction <add>, %101, %cst_40 [1] : vector<8x512xf32> to vector<8xf32>
    %105 = vector.shape_cast %104 : vector<8xf32> to vector<8x1xf32>
    %106 = arith.mulf %101, %101 : vector<8x512xf32>
    %cst_41 = arith.constant dense<0.000000e+00> : vector<8xf32>
    %107 = vector.multi_reduction <add>, %106, %cst_41 [1] : vector<8x512xf32> to vector<8xf32>
    %108 = vector.shape_cast %107 : vector<8xf32> to vector<8x1xf32>
    %cst_42 = arith.constant 0.001953125 : f32
    %109 = vector.broadcast %cst_42 : f32 to vector<8x1xf32>
    %110 = arith.mulf %105, %109 : vector<8x1xf32>
    %cst_43 = arith.constant 0.001953125 : f32
    %111 = vector.broadcast %cst_43 : f32 to vector<8x1xf32>
    %112 = arith.mulf %108, %111 : vector<8x1xf32>
    %113 = arith.mulf %110, %110 : vector<8x1xf32>
    %114 = arith.subf %112, %113 : vector<8x1xf32>
    %cst_44 = arith.constant 9.99999974E-6 : f32
    %115 = vector.broadcast %cst_44 : f32 to vector<8x1xf32>
    %116 = arith.addf %114, %115 : vector<8x1xf32>
    %117 = math.rsqrt %116 : vector<8x1xf32>
    %118 = vector.broadcast %110 : vector<8x1xf32> to vector<8x512xf32>
    %119 = arith.subf %101, %118 : vector<8x512xf32>
    %120 = vector.broadcast %117 : vector<8x1xf32> to vector<8x512xf32>
    %121 = arith.mulf %119, %120 : vector<8x512xf32>
    %122 = vector.broadcast %102 : vector<1x512xf32> to vector<8x512xf32>
    %123 = arith.mulf %121, %122 : vector<8x512xf32>
    %124 = vector.broadcast %103 : vector<1x512xf32> to vector<8x512xf32>
    %125 = arith.addf %123, %124 : vector<8x512xf32>
    %cst_45 = arith.constant 0.000000e+00 : f32
    %126 = vector.broadcast %cst_45 : f32 to vector<8x512xf32>
    %127 = arith.maximumf %125, %126 : vector<8x512xf32>
    %c0_46 = arith.constant 0 : index
    %c0_47 = arith.constant 0 : index
    %128 = vector.load %arg5[%c0_46, %c0_47] : memref<512x256xbf16, #tpu.memory_space<vmem>>, vector<512x256xbf16>
    %129 = arith.extf %128 : vector<512x256xbf16> to vector<512x256xf32>
    %cst_48 = arith.constant dense<0.000000e+00> : vector<8x256xf32>
    %130 = tpu.matmul %127, %129, %cst_48 {dimension_numbers = #tpu.dot_dimension_numbers<[1], [0], [0], [1], [0, 0, 1, 1], [], []>} : vector<8x512xf32>, vector<512x256xf32>, vector<8x256xf32> -> vector<8x256xf32>
    %c0_49 = arith.constant 0 : index
    %c4608 = arith.constant 4608 : index
    %131 = vector.load %arg8[%c0_49, %c4608] : memref<1x6272xf32, #tpu.memory_space<vmem>>, vector<1x256xf32>
    %132 = vector.broadcast %131 : vector<1x256xf32> to vector<8x256xf32>
    %133 = arith.addf %130, %132 : vector<8x256xf32>
    %c0_50 = arith.constant 0 : index
    %c4864 = arith.constant 4864 : index
    %134 = vector.load %arg8[%c0_50, %c4864] : memref<1x6272xf32, #tpu.memory_space<vmem>>, vector<1x256xf32>
    %c0_51 = arith.constant 0 : index
    %c5120 = arith.constant 5120 : index
    %135 = vector.load %arg8[%c0_51, %c5120] : memref<1x6272xf32, #tpu.memory_space<vmem>>, vector<1x256xf32>
    %cst_52 = arith.constant dense<0.000000e+00> : vector<8xf32>
    %136 = vector.multi_reduction <add>, %133, %cst_52 [1] : vector<8x256xf32> to vector<8xf32>
    %137 = vector.shape_cast %136 : vector<8xf32> to vector<8x1xf32>
    %138 = arith.mulf %133, %133 : vector<8x256xf32>
    %cst_53 = arith.constant dense<0.000000e+00> : vector<8xf32>
    %139 = vector.multi_reduction <add>, %138, %cst_53 [1] : vector<8x256xf32> to vector<8xf32>
    %140 = vector.shape_cast %139 : vector<8xf32> to vector<8x1xf32>
    %cst_54 = arith.constant 3.906250e-03 : f32
    %141 = vector.broadcast %cst_54 : f32 to vector<8x1xf32>
    %142 = arith.mulf %137, %141 : vector<8x1xf32>
    %cst_55 = arith.constant 3.906250e-03 : f32
    %143 = vector.broadcast %cst_55 : f32 to vector<8x1xf32>
    %144 = arith.mulf %140, %143 : vector<8x1xf32>
    %145 = arith.mulf %142, %142 : vector<8x1xf32>
    %146 = arith.subf %144, %145 : vector<8x1xf32>
    %cst_56 = arith.constant 9.99999974E-6 : f32
    %147 = vector.broadcast %cst_56 : f32 to vector<8x1xf32>
    %148 = arith.addf %146, %147 : vector<8x1xf32>
    %149 = math.rsqrt %148 : vector<8x1xf32>
    %150 = vector.broadcast %142 : vector<8x1xf32> to vector<8x256xf32>
    %151 = arith.subf %133, %150 : vector<8x256xf32>
    %152 = vector.broadcast %149 : vector<8x1xf32> to vector<8x256xf32>
    %153 = arith.mulf %151, %152 : vector<8x256xf32>
    %154 = vector.broadcast %134 : vector<1x256xf32> to vector<8x256xf32>
    %155 = arith.mulf %153, %154 : vector<8x256xf32>
    %156 = vector.broadcast %135 : vector<1x256xf32> to vector<8x256xf32>
    %157 = arith.addf %155, %156 : vector<8x256xf32>
    %cst_57 = arith.constant 0.000000e+00 : f32
    %158 = vector.broadcast %cst_57 : f32 to vector<8x256xf32>
    %159 = arith.maximumf %157, %158 : vector<8x256xf32>
    %c0_58 = arith.constant 0 : index
    %c0_59 = arith.constant 0 : index
    %160 = vector.load %arg6[%c0_58, %c0_59] : memref<256x256xbf16, #tpu.memory_space<vmem>>, vector<256x256xbf16>
    %161 = arith.extf %160 : vector<256x256xbf16> to vector<256x256xf32>
    %cst_60 = arith.constant dense<0.000000e+00> : vector<8x256xf32>
    %162 = tpu.matmul %159, %161, %cst_60 {dimension_numbers = #tpu.dot_dimension_numbers<[1], [0], [0], [1], [0, 0, 1, 1], [], []>} : vector<8x256xf32>, vector<256x256xf32>, vector<8x256xf32> -> vector<8x256xf32>
    %c0_61 = arith.constant 0 : index
    %c5376 = arith.constant 5376 : index
    %163 = vector.load %arg8[%c0_61, %c5376] : memref<1x6272xf32, #tpu.memory_space<vmem>>, vector<1x256xf32>
    %164 = vector.broadcast %163 : vector<1x256xf32> to vector<8x256xf32>
    %165 = arith.addf %162, %164 : vector<8x256xf32>
    %c0_62 = arith.constant 0 : index
    %c5632 = arith.constant 5632 : index
    %166 = vector.load %arg8[%c0_62, %c5632] : memref<1x6272xf32, #tpu.memory_space<vmem>>, vector<1x256xf32>
    %c0_63 = arith.constant 0 : index
    %c5888 = arith.constant 5888 : index
    %167 = vector.load %arg8[%c0_63, %c5888] : memref<1x6272xf32, #tpu.memory_space<vmem>>, vector<1x256xf32>
    %cst_64 = arith.constant dense<0.000000e+00> : vector<8xf32>
    %168 = vector.multi_reduction <add>, %165, %cst_64 [1] : vector<8x256xf32> to vector<8xf32>
    %169 = vector.shape_cast %168 : vector<8xf32> to vector<8x1xf32>
    %170 = arith.mulf %165, %165 : vector<8x256xf32>
    %cst_65 = arith.constant dense<0.000000e+00> : vector<8xf32>
    %171 = vector.multi_reduction <add>, %170, %cst_65 [1] : vector<8x256xf32> to vector<8xf32>
    %172 = vector.shape_cast %171 : vector<8xf32> to vector<8x1xf32>
    %cst_66 = arith.constant 3.906250e-03 : f32
    %173 = vector.broadcast %cst_66 : f32 to vector<8x1xf32>
    %174 = arith.mulf %169, %173 : vector<8x1xf32>
    %cst_67 = arith.constant 3.906250e-03 : f32
    %175 = vector.broadcast %cst_67 : f32 to vector<8x1xf32>
    %176 = arith.mulf %172, %175 : vector<8x1xf32>
    %177 = arith.mulf %174, %174 : vector<8x1xf32>
    %178 = arith.subf %176, %177 : vector<8x1xf32>
    %cst_68 = arith.constant 9.99999974E-6 : f32
    %179 = vector.broadcast %cst_68 : f32 to vector<8x1xf32>
    %180 = arith.addf %178, %179 : vector<8x1xf32>
    %181 = math.rsqrt %180 : vector<8x1xf32>
    %182 = vector.broadcast %174 : vector<8x1xf32> to vector<8x256xf32>
    %183 = arith.subf %165, %182 : vector<8x256xf32>
    %184 = vector.broadcast %181 : vector<8x1xf32> to vector<8x256xf32>
    %185 = arith.mulf %183, %184 : vector<8x256xf32>
    %186 = vector.broadcast %166 : vector<1x256xf32> to vector<8x256xf32>
    %187 = arith.mulf %185, %186 : vector<8x256xf32>
    %188 = vector.broadcast %167 : vector<1x256xf32> to vector<8x256xf32>
    %189 = arith.addf %187, %188 : vector<8x256xf32>
    %cst_69 = arith.constant 0.000000e+00 : f32
    %190 = vector.broadcast %cst_69 : f32 to vector<8x256xf32>
    %191 = arith.maximumf %189, %190 : vector<8x256xf32>
    %192 = tpu.concatenate %97, %191 in 1 : vector<8x256xf32>, vector<8x256xf32> -> vector<8x512xf32>
    %c0_70 = arith.constant 0 : index
    %c0_71 = arith.constant 0 : index
    %193 = vector.load %arg7[%c0_70, %c0_71] : memref<512x128xbf16, #tpu.memory_space<vmem>>, vector<512x128xbf16>
    %194 = arith.extf %193 : vector<512x128xbf16> to vector<512x128xf32>
    %cst_72 = arith.constant dense<0.000000e+00> : vector<8x128xf32>
    %195 = tpu.matmul %192, %194, %cst_72 {dimension_numbers = #tpu.dot_dimension_numbers<[1], [0], [0], [1], [0, 0, 1, 1], [], []>} : vector<8x512xf32>, vector<512x128xf32>, vector<8x128xf32> -> vector<8x128xf32>
    %c0_73 = arith.constant 0 : index
    %c6144 = arith.constant 6144 : index
    %196 = vector.load %arg8[%c0_73, %c6144] : memref<1x6272xf32, #tpu.memory_space<vmem>>, vector<1x128xf32>
    %197 = vector.broadcast %196 : vector<1x128xf32> to vector<8x128xf32>
    %198 = arith.addf %195, %197 : vector<8x128xf32>
    %c0_74 = arith.constant 0 : index
    %c0_75 = arith.constant 0 : index
    %199 = vector.load %arg9[%c0_74, %c0_75] : memref<8x128xf32, #tpu.memory_space<vmem>>, vector<8x128xf32>
    tpu.vector_store %arg9[%c0_74, %c0_75], %198 {strides = array<i32>} : memref<8x128xf32, #tpu.memory_space<vmem>>, vector<8x128xf32>,
    return
  }
  func.func @transform_0(%arg0: i32) -> (i32, i32) {
    %c0_i32 = arith.constant 0 : i32
    %c0_i32_0 = arith.constant 0 : i32
    return %arg0, %c0_i32 : i32, i32
  }
  func.func @transform_1(%arg0: i32) -> (i32, i32) {
    %c0_i32 = arith.constant 0 : i32
    %c0_i32_0 = arith.constant 0 : i32
    %c0_i32_1 = arith.constant 0 : i32
    return %c0_i32, %c0_i32_0 : i32, i32
  }
  func.func @transform_2(%arg0: i32) -> (i32, i32) {
    %c0_i32 = arith.constant 0 : i32
    %c0_i32_0 = arith.constant 0 : i32
    %c0_i32_1 = arith.constant 0 : i32
    return %c0_i32, %c0_i32_0 : i32, i32
  }
  func.func @transform_3(%arg0: i32) -> (i32, i32) {
    %c0_i32 = arith.constant 0 : i32
    %c0_i32_0 = arith.constant 0 : i32
    %c0_i32_1 = arith.constant 0 : i32
    return %c0_i32, %c0_i32_0 : i32, i32
  }
  func.func @transform_4(%arg0: i32) -> (i32, i32) {
    %c0_i32 = arith.constant 0 : i32
    %c0_i32_0 = arith.constant 0 : i32
    %c0_i32_1 = arith.constant 0 : i32
    return %c0_i32, %c0_i32_0 : i32, i32
  }
  func.func @transform_5(%arg0: i32) -> (i32, i32) {
    %c0_i32 = arith.constant 0 : i32
    %c0_i32_0 = arith.constant 0 : i32
    %c0_i32_1 = arith.constant 0 : i32
    return %c0_i32, %c0_i32_0 : i32, i32
  }
  func.func @transform_6(%arg0: i32) -> (i32, i32) {
    %c0_i32 = arith.constant 0 : i32
    %c0_i32_0 = arith.constant 0 : i32
    %c0_i32_1 = arith.constant 0 : i32
    return %c0_i32, %c0_i32_0 : i32, i32
  }
  func.func @transform_7(%arg0: i32) -> (i32, i32) {
    %c0_i32 = arith.constant 0 : i32
    %c0_i32_0 = arith.constant 0 : i32
    %c0_i32_1 = arith.constant 0 : i32
    return %c0_i32, %c0_i32_0 : i32, i32
  }
  func.func @transform_8(%arg0: i32) -> (i32, i32) {
    %c0_i32 = arith.constant 0 : i32
    %c0_i32_0 = arith.constant 0 : i32
    return %arg0, %c0_i32 : i32, i32
  }
}

</mosaic_0001>

<bundles_post_ra>
// kernel: aggregation_transformer.1
= control target key start
LH: loop header
LB: loop body
LE: loop exit
PB: predicated region body
PF: predicated region fallthrough
CT: control target
= control target key end

     0   :  { %13 = vsyncpa [#allocation3], 0  ;;  %s3167_s0 = inlined_call_operand.hbm [shape: f32[8,32], index: 0, kind: input, shape index: {}]   ;;  %s3168_s1 = inlined_call_operand.hbm [shape: bf16[32,1024], index: 1, kind: input, shape index: {}]   ;;  %s3169_s2 = inlined_call_operand.hbm [shape: bf16[512,256], index: 2, kind: input, shape index: {}]   ;;  %s3170_s3 = inlined_call_operand.hbm [shape: bf16[256,256], index: 3, kind: input, shape index: {}]   ;;  %s3171_s4 = inlined_call_operand.hbm [shape: bf16[512,256], index: 4, kind: input, shape index: {}]   ;;  %s3172_s5 = inlined_call_operand.hbm [shape: bf16[256,256], index: 5, kind: input, shape index: {}]   ;;  %s3173_s6 = inlined_call_operand.hbm [shape: bf16[512,128], index: 6, kind: input, shape index: {}]   ;;  %s3174_s7 = inlined_call_operand.hbm [shape: f32[1,6272], index: 7, kind: input, shape index: {}]   ;;  %s3175_s8 = inlined_call_operand.vmem [shape: f32[8,128], index: 8, kind: output, shape index: {}]  }
   0x1   :  { %14 = vsyncpa [#allocation5], 0 }
   0x2   :  { %15 = vsyncpa [#allocation8], 0 }
   0x3   :  { %16 = vsyncpa [#allocation11], 0  ;;  %s33_s29 = sshll.u32 %s3168_s1, 4  ;;  %s34_s29 = int_to_ptr.hbm [resolvable:$true] %s33_s29 }
   0x4   :  { %17 = vsyncpa [#allocation14], 0  ;;  %s2407_s30 = smov [#allocation4]   ;;  %s2408_s10 = smov 512  }
   0x5   :  { %s35_s9 = sshll.u32 %s2407_s30, 4  ;;  %s2409_s11 = smov 32   ;;  %s36_s9 = int_to_ptr.vmem [resolvable:$true] %s35_s9 }
   0x6   :  { %41 = dma.hbm_to_vmem [thread:$0]  %s34_s29, 2048, %s36_s9, [#allocation5], %s2408_s10, %s2408_s10, %s2409_s11  }
   0x7   :  { %s59_s14 = sshll.u32 %s3170_s3, 4  ;;  %s2410_s15 = smov [#allocation7]   ;;  %s60_s14 = int_to_ptr.hbm [resolvable:$true] %s59_s14 }
   0x8   :  { %s61_s16 = sshll.u32 %s2410_s15, 4  ;;  %s85_s19 = sshll.u32 %s3172_s5, 4  ;;  %s62_s16 = int_to_ptr.vmem [resolvable:$true] %s61_s16  ;;  %s86_s19 = int_to_ptr.hbm [resolvable:$true] %s85_s19 }
   0x9   :  { %s2411_s1 = smov 128   ;;  %s2412_s20 = smov 8  }
   0xa   :  { %67 = dma.hbm_to_vmem [thread:$0]  %s60_s14, 4096, %s62_s16, [#allocation8], %s2411_s1, %s2411_s1, %s2412_s20  }
   0xb   :  { %s23_s23 = sshll.u32 %s3167_s0, 4  ;;  %s2413_s24 = smov [#allocation10]   ;;  %s24_s23 = int_to_ptr.hbm [resolvable:$true] %s23_s23 }
   0xc   :  { %s87_s25 = sshll.u32 %s2413_s24, 4  ;;  %s2414_s3 = smov [#allocation2]   ;;  %s88_s25 = int_to_ptr.vmem [resolvable:$true] %s87_s25 }
   0xd   :  { %93 = dma.hbm_to_vmem [thread:$0]  %s86_s19, 4096, %s88_s25, [#allocation11], %s2411_s1, %s2411_s1, %s2412_s20  }
   0xe   :  { %s25_s26 = sshll.u32 %s2414_s3, 4  ;;  %s46_s5 = sshll.u32 %s3169_s2, 4  ;;  %s26_s26 = int_to_ptr.vmem [resolvable:$true] %s25_s26  ;;  %s47_s5 = int_to_ptr.hbm [resolvable:$true] %s46_s5 }
   0xf   :  { %28 = dma.hbm_to_vmem [thread:$0]  %s24_s23, 128, %s26_s26, [#allocation3]  }
  0x10   :  { %s72_s9 = sshll.u32 %s3171_s4, 4  ;;  %s2415_s10 = smov [#allocation6]   ;;  %s73_s9 = int_to_ptr.hbm [resolvable:$true] %s72_s9 }
  0x11   :  { %s48_s0 = sshll.u32 %s2415_s10, 4  ;;  %s2416_s11 = smov [#allocation9]   ;;  %s49_s0 = int_to_ptr.vmem [resolvable:$true] %s48_s0 }
  0x12   :  { %54 = dma.hbm_to_vmem [thread:$0]  %s47_s5, 8192, %s49_s0, [#allocation5], %s2411_s1, %s2411_s1, %s2412_s20  }
  0x13   :  { %s74_s12 = sshll.u32 %s2416_s11, 4  ;;  %s98_s15 = sshll.u32 %s3173_s6, 4  ;;  %s75_s12 = int_to_ptr.vmem [resolvable:$true] %s74_s12  ;;  %s99_s15 = int_to_ptr.hbm [resolvable:$true] %s98_s15 }
  0x14   :  { %80 = dma.hbm_to_vmem [thread:$0]  %s73_s9, 8192, %s75_s12, [#allocation8], %s2411_s1, %s2411_s1, %s2412_s20  }
  0x15   :  { %s2417_s2 = smov [#allocation12]   ;;  %s112_s4 = sshll.u32 %s3174_s7, 4  ;;  %s113_s4 = int_to_ptr.hbm [resolvable:$true] %s112_s4 }
  0x16   :  { %s100_s16 = sshll.u32 %s2417_s2, 4  ;;  %s2418_s19 = smov 64   ;;  %s101_s16 = int_to_ptr.vmem [resolvable:$true] %s100_s16 }
  0x17   :  { %s2419_s21 = smov 4   ;;  %s2420_s22 = smov [#allocation13]  }
  0x18   :  { %106 = dma.hbm_to_vmem [thread:$0]  %s99_s15, 4096, %s101_s16, [#allocation11], %s2418_s19, %s2418_s19, %s2419_s21  }
  0x19   :  { %s114_s23 = sshll.u32 %s2420_s22, 4  ;;  %s115_s23 = int_to_ptr.vmem [resolvable:$true] %s114_s23 }
  0x1a   :  { %117 = dma.hbm_to_vmem [thread:$0]  %s113_s4, 784, %s115_s23, [#allocation14]  }
  0x1b   :  { %2397 = dma.done.wait [#allocation3], 128  }
  0x1c   :  { %2398 = vsyncadd [#allocation3], 4294967168 }
  0x1d   :  { %2399 = dma.done.wait [#allocation5], 10240  }
  0x1e   :  { %2400 = vsyncadd [#allocation5], 4294957056 }
  0x1f   :  { %2401 = dma.done.wait [#allocation8], 12288  }
  0x20   :  { %2402 = vsyncadd [#allocation8], 4294955008 }
  0x21   :  { %2403 = dma.done.wait [#allocation11], 8192  }
  0x22   :  { %2404 = vsyncadd [#allocation11], 4294959104 }
  0x23   :  { %2405 = dma.done.wait [#allocation14], 784  }
  0x24   :  { %2406 = vsyncadd [#allocation14], 4294966512  ;;  %v164_v0 = vld [vmem:[#allocation4 + $0x68] sm:$0xff]  ;;  %v163_v2 = vld [vmem:[#allocation4 + $0x60] sm:$0xff]  ;;  %vm199_vm0 = vcmask 261120  }
  0x25   :  { %v160_v1 = vld [vmem:[#allocation4 + $0x48] sm:$0xff]  ;;  %v193_v3 = vunpack.c.l.bf16 %v164_v0  ;;  %v194_v5 = vunpack.c.h.bf16 %v164_v0  ;;  %v191_v6 = vunpack.c.l.bf16 %v163_v2  ;;  %v159_v8 = vld [vmem:[#allocation4 + $0x40] sm:$0xff]  ;;  %v192_v9 = vunpack.c.h.bf16 %v163_v2  ;;  %v166_v22 = vld [vmem:[#allocation4 + $0x78] sm:$0xff] }
  0x26   :  { %v185_v4 = vunpack.c.l.bf16 %v160_v1  ;;  %v156_v7 = vld [vmem:[#allocation4 + $0x28] sm:$0xff]  ;;  %v186_v10 = vunpack.c.h.bf16 %v160_v1  ;;  %v183_v11 = vunpack.c.l.bf16 %v159_v8  ;;  %v155_v13 = vld [vmem:[#allocation4 + $0x20] sm:$0xff]  ;;  %v184_v15 = vunpack.c.h.bf16 %v159_v8  ;;  %v150_v23 = vld [vmem:[#allocation2] sm:$0xff] }
  0x27   :  { %v152_v12 = vld [vmem:[#allocation4 + $0x8] sm:$0xff]  ;;  %255 = vmatpush.msra.mxu2 %v193_v3  ;;  %275 = vmatpush.msra.mxu3 %v194_v5  ;;  %v177_v14 = vunpack.c.l.bf16 %v156_v7  ;;  %v178_v16 = vunpack.c.h.bf16 %v156_v7  ;;  %v175_v17 = vunpack.c.l.bf16 %v155_v13  ;;  %v176_v18 = vunpack.c.h.bf16 %v155_v13  ;;  %v151_v19 = vld [vmem:[#allocation4] sm:$0xff]  ;;  %v165_v26 = vld [vmem:[#allocation4 + $0x70] sm:$0xff] }
  0x28   :  { %215 = vmatpush.msra.mxu0 %v191_v6  ;;  %235 = vmatpush.msra.mxu1 %v192_v9  ;;  %v169_v20 = vunpack.c.l.bf16 %v152_v12  ;;  %v170_v21 = vunpack.c.h.bf16 %v152_v12  ;;  %v167_v24 = vunpack.c.l.bf16 %v151_v19  ;;  %v168_v25 = vunpack.c.h.bf16 %v151_v19  ;;  %v162_v27 = vld [vmem:[#allocation4 + $0x58] sm:$0xff]  ;;  %v161_v30 = vld [vmem:[#allocation4 + $0x50] sm:$0xff]  ;;  %v2520_v63 = vld [vmem:[#allocation6 + $0x68] sm:$0xff] }
  0x29   :  { %256 = vmatpush.msra.mxu2 %v185_v4  ;;  %276 = vmatpush.msra.mxu3 %v186_v10  ;;  %v197_v28 = vunpack.c.l.bf16 %v166_v22  ;;  %v198_v29 = vunpack.c.h.bf16 %v166_v22  ;;  %v195_v31 = vunpack.c.l.bf16 %v165_v26  ;;  %v196_v32 = vunpack.c.h.bf16 %v165_v26  ;;  %v158_v33 = vld [vmem:[#allocation4 + $0x38] sm:$0xff]  ;;  %v157_v36 = vld [vmem:[#allocation4 + $0x30] sm:$0xff]  ;;  %v2525_v3 = vld [vmem:[#allocation6 + $0xe8] sm:$0xff] }
  0x2a   :  { %216 = vmatpush.msra.mxu0 %v183_v11  ;;  %236 = vmatpush.msra.mxu1 %v184_v15  ;;  %v189_v34 = vunpack.c.l.bf16 %v162_v27  ;;  %v190_v35 = vunpack.c.h.bf16 %v162_v27  ;;  %v187_v37 = vunpack.c.l.bf16 %v161_v30  ;;  %v188_v38 = vunpack.c.h.bf16 %v161_v30  ;;  %v154_v39 = vld [vmem:[#allocation4 + $0x18] sm:$0xff]  ;;  %v153_v44 = vld [vmem:[#allocation4 + $0x10] sm:$0xff]  ;;  %v2527_v4 = vld [vmem:[#allocation6 + $0x168] sm:$0xff] }
  0x2b   :  { %257 = vmatpush.msra.mxu2 %v177_v14  ;;  %277 = vmatpush.msra.mxu3 %v178_v16  ;;  %v181_v40 = vunpack.c.l.bf16 %v158_v33  ;;  %v182_v41 = vunpack.c.h.bf16 %v158_v33  ;;  %v179_v42 = vunpack.c.l.bf16 %v157_v36  ;;  %v180_v43 = vunpack.c.h.bf16 %v157_v36  ;;  %v2498_v49 = vld [vmem:[#allocation6 + $0x78] sm:$0xff]  ;;  %v2509_v56 = vld [vmem:[#allocation6 + $0x70] sm:$0xff]  ;;  %v2529_v5 = vld [vmem:[#allocation6 + $0x1e8] sm:$0xff] }
  0x2c   :  { %217 = vmatpush.msra.mxu0 %v175_v17  ;;  %237 = vmatpush.msra.mxu1 %v176_v18  ;;  %v173_v45 = vunpack.c.l.bf16 %v154_v39  ;;  %v174_v46 = vunpack.c.h.bf16 %v154_v39  ;;  %v171_v47 = vunpack.c.l.bf16 %v153_v44  ;;  %v172_v48 = vunpack.c.h.bf16 %v153_v44  ;;  %v2500_v50 = vld [vmem:[#allocation6 + $0xf8] sm:$0xff]  ;;  %v2511_v57 = vld [vmem:[#allocation6 + $0xf0] sm:$0xff]  ;;  %v2534_v9 = vld [vmem:[#allocation6 + $0x60] sm:$0xff] }
  0x2d   :  { %258 = vmatpush.msra.mxu2 %v169_v20  ;;  %278 = vmatpush.msra.mxu3 %v170_v21  ;;  %v2502_v51 = vld [vmem:[#allocation6 + $0x178] sm:$0xff]  ;;  %v540_v52 = vunpack.c.l.bf16 %v2498_v49  ;;  %v572_v53 = vunpack.c.l.bf16 %v2500_v50  ;;  %v538_v59 = vunpack.c.l.bf16 %v2509_v56  ;;  %v570_v60 = vunpack.c.l.bf16 %v2511_v57  ;;  %v2516_v61 = vld [vmem:[#allocation6 + $0x170] sm:$0xff]  ;;  %v2536_v10 = vld [vmem:[#allocation6 + $0xe0] sm:$0xff] }
  0x2e   :  { %2013 = vmatmul.msk.f32.vlgmr.msra.gmra.mxu2 %vm199_vm0, %v150_v23  ;;  %2014 = vmatmul.msk.f32.vlgmr.msra.gmra.mxu3 %vm199_vm0, %v150_v23  ;;  %v604_v54 = vunpack.c.l.bf16 %v2502_v51  ;;  %v2507_v55 = vld [vmem:[#allocation6 + $0x1f8] sm:$0xff]  ;;  %v2518_v62 = vld [vmem:[#allocation6 + $0x1f0] sm:$0xff]  ;;  %v602_v0 = vunpack.c.l.bf16 %v2516_v61  ;;  %v536_v2 = vunpack.c.l.bf16 %v2520_v63  ;;  %v568_v6 = vunpack.c.l.bf16 %v2525_v3  ;;  %v2538_v11 = vld [vmem:[#allocation13] sm:$0xf] }
  0x2f   :  { %218 = vmatpush.msra.mxu0 %v167_v24  ;;  %238 = vmatpush.msra.mxu1 %v168_v25  ;;  %v636_v58 = vunpack.c.l.bf16 %v2507_v55  ;;  %v634_v1 = vunpack.c.l.bf16 %v2518_v62  ;;  %v600_v7 = vunpack.c.l.bf16 %v2527_v4  ;;  %v632_v8 = vunpack.c.l.bf16 %v2529_v5  ;;  %v2542_v14 = vld [vmem:[#allocation6 + $0x160] sm:$0xff]  ;;  %v2546_v16 = vld [vmem:[#allocation6 + $0x58] sm:$0xff]  ;;  %v2558_v24 = vld [vmem:[#allocation6 + $0x50] sm:$0xff] }
  0x30   :  { %2011 = vmatmul.msk.f32.vlgmr.msra.gmra.mxu0 %vm199_vm0, %v150_v23  ;;  %2012 = vmatmul.msk.f32.vlgmr.msra.gmra.mxu1 %vm199_vm0, %v150_v23  ;;  %v534_v12 = vunpack.c.l.bf16 %v2534_v9  ;;  %v566_v13 = vunpack.c.l.bf16 %v2536_v10  ;;  %v2544_v15 = vld [vmem:[#allocation6 + $0x1e0] sm:$0xff]  ;;  %v598_v17 = vunpack.c.l.bf16 %v2542_v14  ;;  %v2550_v19 = vld [vmem:[#allocation6 + $0xd8] sm:$0xff]  ;;  %v532_v22 = vunpack.c.l.bf16 %v2546_v16  ;;  %v2560_v25 = vld [vmem:[#allocation6 + $0xd0] sm:$0xff] }
  0x31   :  { %335 = vmatpush.msrb.mxu2 %v197_v28  ;;  %355 = vmatpush.msrb.mxu3 %v198_v29  ;;  %v630_v18 = vunpack.c.l.bf16 %v2544_v15  ;;  %v2552_v20 = vld [vmem:[#allocation6 + $0x158] sm:$0xff]  ;;  %v2562_v26 = vld [vmem:[#allocation6 + $0x150] sm:$0xff]  ;;  %v2568_v30 = vld [vmem:[#allocation6 + $0x48] sm:$0xff]  ;;  %v562_v33 = vunpack.c.l.bf16 %v2560_v25  ;;  %v365_v36 = vperm.slane %v2538_v11, 0 }
  0x32   :  { %295 = vmatpush.msrb.mxu0 %v195_v31  ;;  %315 = vmatpush.msrb.mxu1 %v196_v32  ;;  %v2554_v21 = vld [vmem:[#allocation6 + $0x1d8] sm:$0xff]  ;;  %v596_v27 = vunpack.c.l.bf16 %v2552_v20  ;;  %v2566_v29 = vld [vmem:[#allocation6 + $0x1d0] sm:$0xff]  ;;  %v2570_v31 = vld [vmem:[#allocation6 + $0xc8] sm:$0xff]  ;;  %v530_v32 = vunpack.c.l.bf16 %v2558_v24 }
  0x33   :  { %336 = vmatpush.msrb.mxu2 %v189_v34  ;;  %356 = vmatpush.msrb.mxu3 %v190_v35  ;;  %v628_v28 = vunpack.c.l.bf16 %v2554_v21  ;;  %v2574_v34 = vld [vmem:[#allocation6 + $0x148] sm:$0xff]  ;;  %v626_v39 = vunpack.c.l.bf16 %v2566_v29 }
  0x34   :  { %296 = vmatpush.msrb.mxu0 %v187_v37  ;;  %316 = vmatpush.msrb.mxu1 %v188_v38  ;;  %v2576_v35 = vld [vmem:[#allocation6 + $0x1c8] sm:$0xff]  ;;  %v366_v37 = vperm.slane %v2538_v11, 1  ;;  %v594_v38 = vunpack.c.l.bf16 %v2562_v26 }
  0x35   :  { %337 = vmatpush.msrb.mxu2 %v181_v40  ;;  %357 = vmatpush.msrb.mxu3 %v182_v41  ;;  %v528_v40 = vunpack.c.l.bf16 %v2568_v30  ;;  %v560_v41 = vunpack.c.l.bf16 %v2570_v31 }
  0x36   :  { %297 = vmatpush.msrb.mxu0 %v179_v42  ;;  %317 = vmatpush.msrb.mxu1 %v180_v43  ;;  %v592_v42 = vunpack.c.l.bf16 %v2574_v34  ;;  %v624_v43 = vunpack.c.l.bf16 %v2576_v35 }
  0x37   :  { %338 = vmatpush.msrb.mxu2 %v173_v45  ;;  %358 = vmatpush.msrb.mxu3 %v174_v46 }
  0x38   :  { %2017 = vmatmul.msk.f32.vlgmr.msrb.gmra.mxu2 %vm199_vm0, %v150_v23  ;;  %2018 = vmatmul.msk.f32.vlgmr.msrb.gmra.mxu3 %vm199_vm0, %v150_v23 }
  0x39   :  { %298 = vmatpush.msrb.mxu0 %v171_v47  ;;  %318 = vmatpush.msrb.mxu1 %v172_v48  ;;  %v367_v48 = vperm.slane %v2538_v11, 2 }
  0x3a   :  { %2015 = vmatmul.msk.f32.vlgmr.msrb.gmra.mxu0 %vm199_vm0, %v150_v23  ;;  %2016 = vmatmul.msk.f32.vlgmr.msrb.gmra.mxu1 %vm199_vm0, %v150_v23  ;;  %v564_v23 = vunpack.c.l.bf16 %v2550_v19 }
  0x3b   :  { %644 = vmatpush.msra.mxu0 %v540_v52  ;;  %664 = vmatpush.msra.mxu1 %v572_v53  ;;  %v368_v52 = vperm.slane %v2538_v11, 3 }
  0x3c   :  { %684 = vmatpush.msra.mxu2 %v604_v54  ;;  %704 = vmatpush.msra.mxu3 %v636_v58 }
  0x3d   :  { %645 = vmatpush.msra.mxu0 %v538_v59  ;;  %665 = vmatpush.msra.mxu1 %v570_v60 }
  0x3e   :  { %685 = vmatpush.msra.mxu2 %v602_v0  ;;  %705 = vmatpush.msra.mxu3 %v634_v1 }
  0x3f   :  { %646 = vmatpush.msra.mxu0 %v536_v2  ;;  %666 = vmatpush.msra.mxu1 %v568_v6 }
  0x40   :  { %686 = vmatpush.msra.mxu2 %v600_v7  ;;  %706 = vmatpush.msra.mxu3 %v632_v8 }
  0x41   :  { %647 = vmatpush.msra.mxu0 %v534_v12  ;;  %667 = vmatpush.msra.mxu1 %v566_v13 }
  0x42   :  { %687 = vmatpush.msra.mxu2 %v598_v17  ;;  %707 = vmatpush.msra.mxu3 %v630_v18  ;;  %v1076_v17 = vld [vmem:[#allocation13 + $0x18] sm:$0xf] }
  0x43   :  { %648 = vmatpush.msra.mxu0 %v532_v22  ;;  %668 = vmatpush.msra.mxu1 %v564_v23  ;;  %v1078_v18 = vperm.slane %v1076_v17, 0  ;;  %v1079_v22 = vperm.slane %v1076_v17, 1 }
  0x44   :  { %688 = vmatpush.msra.mxu2 %v596_v27  ;;  %708 = vmatpush.msra.mxu3 %v628_v28  ;;  %v1080_v28 = vperm.slane %v1076_v17, 2 }
  0x45   :  { %649 = vmatpush.msra.mxu0 %v530_v32  ;;  %669 = vmatpush.msra.mxu1 %v562_v33 }
  0x46   :  { %689 = vmatpush.msra.mxu2 %v594_v38  ;;  %709 = vmatpush.msra.mxu3 %v626_v39 }
  0x47   :  { %650 = vmatpush.msra.mxu0 %v528_v40  ;;  %670 = vmatpush.msra.mxu1 %v560_v41 }
  0x48   :  { %690 = vmatpush.msra.mxu2 %v592_v42  ;;  %710 = vmatpush.msra.mxu3 %v624_v43  ;;  %v2618_v42 = vld [vmem:[#allocation6 + $0x40] sm:$0xff] }
  0x49   :  { %v2620_v43 = vld [vmem:[#allocation6 + $0xc0] sm:$0xff] }
  0xad   :  { %v220_v44 = vpop.f32.mrf.mxu0  ;;  %v240_v45 = vpop.f32.mrf.mxu1 }
  0xae   :  { %v2586_v46 = vadd.f32 %v365_v36, %v220_v44  ;;  %v2588_v47 = vadd.f32 %v366_v37, %v240_v45  ;;  %v1081_v37 = vperm.slane %v1076_v17, 3  ;;  %v2622_v44 = vld [vmem:[#allocation6 + $0x140] sm:$0xff]  ;;  %v2645_v17 = vld [vmem:[#allocation6 + $0x1b8] sm:$0xff] }
  0xb0   :  { %3229 = vst [vmem:[#allocation20_spill] sm:$0xff] %v2586_v46  ;;  %v379_v53 = vadd.f32 %v2588_v47, %v2586_v46  ;;  %v384_v59 = vmul.f32 %v2586_v46, %v2586_v46  ;;  %v385_v60 = vmul.f32 %v2588_v47, %v2588_v47  ;;  %v2704_v46 = vld [vmem:[#allocation6 + $0x110] sm:$0xff] }
  0xb1   :  { %3230 = vst [vmem:[#allocation21_spill] sm:$0xff] %v2588_v47  ;;  %v260_v54 = vpop.f32.mrf.mxu2  ;;  %v280_v58 = vpop.f32.mrf.mxu3  ;;  %v2690_v47 = vld [vmem:[#allocation6 + $0x98] sm:$0xff] }
  0xb2   :  { %v2598_v0 = vadd.f32 %v367_v48, %v260_v54  ;;  %v2600_v1 = vadd.f32 %v368_v52, %v280_v58  ;;  %v388_v8 = vadd.f32 %v385_v60, %v384_v59  ;;  %v526_v48 = vunpack.c.l.bf16 %v2618_v42  ;;  %v2628_v54 = vld [vmem:[#allocation6 + $0x1c0] sm:$0xff]  ;;  %3238 = vst [vmem:[#allocation29_spill] sm:$0xff] %v2690_v47 }
  0xb3   :  { %v558_v52 = vunpack.c.l.bf16 %v2620_v43  ;;  %v622_v59 = vunpack.c.l.bf16 %v2628_v54  ;;  %3243 = vst [vmem:[#allocation34_spill] sm:$0xff] %v2704_v46 }
  0xb4   :  { %3231 = vst [vmem:[#allocation22_spill] sm:$0xff] %v2598_v0  ;;  %v380_v2 = vadd.f32 %v379_v53, %v2598_v0  ;;  %v386_v6 = vmul.f32 %v2598_v0, %v2598_v0  ;;  %v387_v11 = vmul.f32 %v2600_v1, %v2600_v1  ;;  %v590_v53 = vunpack.c.l.bf16 %v2622_v44  ;;  %651 = vmatpush.msra.mxu0 %v526_v48  ;;  %v2663_v48 = vld [vmem:[#allocation6 + $0xa8] sm:$0xff] }
  0xb5   :  { %3232 = vst [vmem:[#allocation23_spill] sm:$0xff] %v2600_v1  ;;  %671 = vmatpush.msra.mxu1 %v558_v52  ;;  %711 = vmatpush.msra.mxu3 %v622_v59  ;;  %v552_v59 = vunpack.c.l.bf16 %v2663_v48 }
  0xb6   :  { %v381_v7 = vadd.f32 %v380_v2, %v2600_v1  ;;  %v389_v12 = vadd.f32 %v388_v8, %v386_v6  ;;  %v2634_v2 = vld [vmem:[#allocation6 + $0x38] sm:$0xff]  ;;  %691 = vmatpush.msra.mxu2 %v590_v53  ;;  %v2678_v1 = vld [vmem:[#allocation6 + $0x120] sm:$0xff] }
  0xb7   :  { %v300_v23 = vpop.f32.mrf.mxu0  ;;  %v320_v27 = vpop.f32.mrf.mxu1  ;;  %v2636_v6 = vld [vmem:[#allocation6 + $0xb8] sm:$0xff] }
  0xb8   :  { %382 = vadd.xlane.f32.xlu0 %v381_v7  ;;  %v390_v13 = vadd.f32 %v389_v12, %v387_v11  ;;  %v2608_v33 = vadd.f32 %v1078_v18, %v300_v23  ;;  %v2610_v36 = vadd.f32 %v1079_v22, %v320_v27  ;;  %v2638_v7 = vld [vmem:[#allocation6 + $0x138] sm:$0xff]  ;;  %v524_v11 = vunpack.c.l.bf16 %v2634_v2  ;;  %v2648_v22 = vld [vmem:[#allocation6 + $0x30] sm:$0xff] }
  0xb9   :  { %v556_v12 = vunpack.c.l.bf16 %v2636_v6  ;;  %v620_v18 = vunpack.c.l.bf16 %v2645_v17  ;;  %v2650_v23 = vld [vmem:[#allocation6 + $0xb0] sm:$0xff] }
  0xba   :  { %3233 = vst [vmem:[#allocation24_spill] sm:$0xff] %v2608_v33  ;;  %v1092_v41 = vadd.f32 %v2610_v36, %v2608_v33  ;;  %v1097_v58 = vmul.f32 %v2608_v33, %v2608_v33  ;;  %v1098_v8 = vmul.f32 %v2610_v36, %v2610_v36  ;;  %v2652_v27 = vld [vmem:[#allocation6 + $0x130] sm:$0xff]  ;;  %652 = vmatpush.msra.mxu0 %v524_v11  ;;  %v2670_v11 = vld [vmem:[#allocation6 + $0x1a8] sm:$0xff] }
  0xbb   :  { %v340_v32 = vpop.f32.mrf.mxu2  ;;  %3234 = vst [vmem:[#allocation25_spill] sm:$0xff] %v2610_v36  ;;  %v360_v38 = vpop.f32.mrf.mxu3  ;;  %672 = vmatpush.msra.mxu1 %v556_v12  ;;  %712 = vmatpush.msra.mxu3 %v620_v18  ;;  %v616_v36 = vunpack.c.l.bf16 %v2670_v11  ;;  %v2674_v12 = vld [vmem:[#allocation6 + $0x20] sm:$0xff] }
  0xbc   :  { %v2612_v39 = vadd.f32 %v1080_v28, %v340_v32  ;;  %v2614_v40 = vadd.f32 %v1081_v37, %v360_v38  ;;  %v522_v32 = vunpack.c.l.bf16 %v2648_v22  ;;  %v554_v37 = vunpack.c.l.bf16 %v2650_v23 }
  0xbd   :  { %v586_v38 = vunpack.c.l.bf16 %v2652_v27  ;;  %v1101_v33 = vadd.f32 %v1098_v8, %v1097_v58  ;;  %v582_v8 = vunpack.c.l.bf16 %v2678_v1 }
  0xbe   :  { %3235 = vst [vmem:[#allocation26_spill] sm:$0xff] %v2612_v39  ;;  %v1093_v45 = vadd.f32 %v1092_v41, %v2612_v39  ;;  %v1099_v28 = vmul.f32 %v2612_v39, %v2612_v39  ;;  %v2659_v41 = vld [vmem:[#allocation6 + $0x1b0] sm:$0xff]  ;;  %653 = vmatpush.msra.mxu0 %v522_v32  ;;  %673 = vmatpush.msra.mxu1 %v554_v37  ;;  %v518_v32 = vunpack.c.l.bf16 %v2674_v12  ;;  %v2685_v37 = vld [vmem:[#allocation6 + $0x1a0] sm:$0xff] }
  0xbf   :  { %3236 = vst [vmem:[#allocation27_spill] sm:$0xff] %v2614_v40  ;;  %v618_v52 = vunpack.c.l.bf16 %v2659_v41  ;;  %v1100_v0 = vmul.f32 %v2614_v40, %v2614_v40 }
  0xc0   :  { %391 = vadd.xlane.f32.xlu0 %v390_v13  ;;  %v1094_v60 = vadd.f32 %v1093_v45, %v2614_v40  ;;  %v588_v13 = vunpack.c.l.bf16 %v2638_v7  ;;  %v2661_v45 = vld [vmem:[#allocation6 + $0x28] sm:$0xff]  ;;  %v1102_v18 = vadd.f32 %v1101_v33, %v1099_v28  ;;  %674 = vmatpush.msra.mxu1 %v552_v59  ;;  %v2692_v40 = vld [vmem:[#allocation6 + $0x118] sm:$0xff] }
  0xc1   :  { %v520_v53 = vunpack.c.l.bf16 %v2661_v45  ;;  %713 = vmatpush.msra.mxu3 %v618_v52  ;;  %3239 = vst [vmem:[#allocation30_spill] sm:$0xff] %v2692_v40  ;;  %v580_v28 = vunpack.c.l.bf16 %v2692_v40  ;;  %v2697_v59 = vld [vmem:[#allocation6 + $0x198] sm:$0xff]  ;;  %v578_v40 = vunpack.c.l.bf16 %v2704_v46 }
  0xc2   :  { %1095 = vadd.xlane.f32.xlu2 %v1094_v60  ;;  %692 = vmatpush.msra.mxu2 %v588_v13  ;;  %v2668_v60 = vld [vmem:[#allocation6 + $0x128] sm:$0xff]  ;;  %v2676_v13 = vld [vmem:[#allocation6 + $0xa0] sm:$0xff]  ;;  %v1103_v52 = vadd.f32 %v1102_v18, %v1100_v0  ;;  %3240 = vst [vmem:[#allocation31_spill] sm:$0xff] %v2697_v59  ;;  %v612_v0 = vunpack.c.l.bf16 %v2697_v59  ;;  %v2702_v18 = vld [vmem:[#allocation6 + $0x90] sm:$0xff] }
  0xc3   :  { %v584_v39 = vunpack.c.l.bf16 %v2668_v60  ;;  %654 = vmatpush.msra.mxu0 %v520_v53  ;;  %v550_v58 = vunpack.c.l.bf16 %v2676_v13  ;;  %714 = vmatpush.msra.mxu3 %v616_v36  ;;  %v2688_v53 = vld [vmem:[#allocation6 + $0x18] sm:$0xff]  ;;  %v2700_v36 = vld [vmem:[#allocation6 + $0x10] sm:$0xff]  ;;  %3242 = vst [vmem:[#allocation33_spill] sm:$0xff] %v2702_v18  ;;  %v2714_v59 = vld [vmem:[#allocation6 + $0x88] sm:$0xff] }
  0xc4   :  { %693 = vmatpush.msra.mxu2 %v586_v38  ;;  %v614_v38 = vunpack.c.l.bf16 %v2685_v37  ;;  %3237 = vst [vmem:[#allocation28_spill] sm:$0xff] %v2688_v53  ;;  %v516_v33 = vunpack.c.l.bf16 %v2688_v53  ;;  %v2716_v53 = vld [vmem:[#allocation6 + $0x108] sm:$0xff] }
  0xc5   :  { %655 = vmatpush.msra.mxu0 %v518_v32  ;;  %675 = vmatpush.msra.mxu1 %v550_v58  ;;  %3241 = vst [vmem:[#allocation32_spill] sm:$0xff] %v2700_v36  ;;  %v514_v32 = vunpack.c.l.bf16 %v2700_v36  ;;  %v546_v58 = vunpack.c.l.bf16 %v2702_v18  ;;  %v576_v46 = vunpack.c.l.bf16 %v2716_v53  ;;  %v2721_v18 = vld [vmem:[#allocation6 + $0x188] sm:$0xff]  ;;  %v2728_v36 = vld [vmem:[#allocation6 + $0x100] sm:$0xff] }
  0xc6   :  { %694 = vmatpush.msra.mxu2 %v584_v39  ;;  %v548_v39 = vunpack.c.l.bf16 %v2690_v47  ;;  %715 = vmatpush.msra.mxu3 %v614_v38  ;;  %v2709_v47 = vld [vmem:[#allocation6 + $0x190] sm:$0xff]  ;;  %v2712_v38 = vld [vmem:[#allocation6 + $0x8] sm:$0xff]  ;;  %3246 = vst [vmem:[#allocation37_spill] sm:$0xff] %v2714_v59 }
  0xc7   :  { %656 = vmatpush.msra.mxu0 %v516_v33  ;;  %3244 = vst [vmem:[#allocation35_spill] sm:$0xff] %v2709_v47  ;;  %v544_v33 = vunpack.c.l.bf16 %v2714_v59  ;;  %v2733_v59 = vld [vmem:[#allocation6 + $0x180] sm:$0xff] }
  0xc8   :  { %695 = vmatpush.msra.mxu2 %v582_v8  ;;  %676 = vmatpush.msra.mxu1 %v548_v39  ;;  %v610_v8 = vunpack.c.l.bf16 %v2709_v47  ;;  %3245 = vst [vmem:[#allocation36_spill] sm:$0xff] %v2712_v38  ;;  %v608_v39 = vunpack.c.l.bf16 %v2721_v18  ;;  %v2726_v47 = vld [vmem:[#allocation6 + $0x80] sm:$0xff] }
  0xc9   :  { %3247 = vst [vmem:[#allocation38_spill] sm:$0xff] %v2716_v53  ;;  %716 = vmatpush.msra.mxu3 %v612_v0  ;;  %657 = vmatpush.msra.mxu0 %v514_v32  ;;  %v542_v32 = vunpack.c.l.bf16 %v2726_v47  ;;  %v574_v53 = vunpack.c.l.bf16 %v2728_v36 }
  0xca   :  { %1104 = vadd.xlane.f32.xlu2 %v1103_v52  ;;  %696 = vmatpush.msra.mxu2 %v580_v28  ;;  %v512_v52 = vunpack.c.l.bf16 %v2712_v38  ;;  %3248 = vst [vmem:[#allocation39_spill] sm:$0xff] %v2721_v18  ;;  %v2724_v28 = vld [vmem:[#allocation6] sm:$0xff]  ;;  %v573_v18 = vunpack.c.h.bf16 %v2500_v50  ;;  %v605_v38 = vunpack.c.h.bf16 %v2502_v51  ;;  %v537_v50 = vunpack.c.h.bf16 %v2520_v63 }
  0xcb   :  { %677 = vmatpush.msra.mxu1 %v546_v58  ;;  %3249 = vst [vmem:[#allocation40_spill] sm:$0xff] %v2728_v36  ;;  %717 = vmatpush.msra.mxu3 %v610_v8  ;;  %v510_v0 = vunpack.c.l.bf16 %v2724_v28  ;;  %v541_v58 = vunpack.c.h.bf16 %v2498_v49  ;;  %v637_v8 = vunpack.c.h.bf16 %v2507_v55  ;;  %v571_v36 = vunpack.c.h.bf16 %v2511_v57 }
  0xcc   :  { %697 = vmatpush.msra.mxu2 %v578_v40  ;;  %658 = vmatpush.msra.mxu0 %v512_v52  ;;  %v606_v40 = vunpack.c.l.bf16 %v2733_v59  ;;  %v539_v52 = vunpack.c.h.bf16 %v2509_v56  ;;  %v635_v49 = vunpack.c.h.bf16 %v2518_v62  ;;  %v569_v51 = vunpack.c.h.bf16 %v2525_v3 }
  0xcd   :  { %678 = vmatpush.msra.mxu1 %v544_v33  ;;  %718 = vmatpush.msra.mxu3 %v608_v39  ;;  %v601_v55 = vunpack.c.h.bf16 %v2527_v4  ;;  %v633_v56 = vunpack.c.h.bf16 %v2529_v5  ;;  %v535_v57 = vunpack.c.h.bf16 %v2534_v9  ;;  %v599_v62 = vunpack.c.h.bf16 %v2542_v14  ;;  %v3251_v33 = vld [vmem:[#allocation29_spill] sm:$0xff] }
  0xce   :  { %698 = vmatpush.msra.mxu2 %v576_v46  ;;  %659 = vmatpush.msra.mxu0 %v510_v0  ;;  %v603_v46 = vunpack.c.h.bf16 %v2516_v61  ;;  %v567_v61 = vunpack.c.h.bf16 %v2536_v10  ;;  %v631_v63 = vunpack.c.h.bf16 %v2544_v15  ;;  %v533_v3 = vunpack.c.h.bf16 %v2546_v16  ;;  %v3253_v0 = vld [vmem:[#allocation31_spill] sm:$0xff] }
  0xcf   :  { %679 = vmatpush.msra.mxu1 %v542_v32  ;;  %719 = vmatpush.msra.mxu3 %v606_v40  ;;  %v565_v4 = vunpack.c.h.bf16 %v2550_v19  ;;  %v597_v5 = vunpack.c.h.bf16 %v2552_v20  ;;  %v629_v9 = vunpack.c.h.bf16 %v2554_v21  ;;  %v531_v10 = vunpack.c.h.bf16 %v2558_v24 }
  0xd0   :  { %699 = vmatpush.msra.mxu2 %v574_v53  ;;  %724 = vmatpush.msrb.mxu0 %v541_v58  ;;  %v563_v14 = vunpack.c.h.bf16 %v2560_v25  ;;  %v595_v15 = vunpack.c.h.bf16 %v2562_v26  ;;  %v627_v16 = vunpack.c.h.bf16 %v2566_v29  ;;  %v529_v19 = vunpack.c.h.bf16 %v2568_v30  ;;  %v3255_v58 = vld [vmem:[#allocation33_spill] sm:$0xff] }
  0xd1   :  { %744 = vmatpush.msrb.mxu1 %v573_v18  ;;  %784 = vmatpush.msrb.mxu3 %v637_v8  ;;  %v561_v20 = vunpack.c.h.bf16 %v2570_v31  ;;  %v593_v21 = vunpack.c.h.bf16 %v2574_v34  ;;  %v625_v24 = vunpack.c.h.bf16 %v2576_v35  ;;  %v527_v25 = vunpack.c.h.bf16 %v2618_v42 }
  0xd2   :  { %764 = vmatpush.msrb.mxu2 %v605_v38  ;;  %725 = vmatpush.msrb.mxu0 %v539_v52  ;;  %v559_v26 = vunpack.c.h.bf16 %v2620_v43  ;;  %v591_v29 = vunpack.c.h.bf16 %v2622_v44  ;;  %v623_v30 = vunpack.c.h.bf16 %v2628_v54  ;;  %v525_v31 = vunpack.c.h.bf16 %v2634_v2  ;;  %v3256_v52 = vld [vmem:[#allocation34_spill] sm:$0xff] }
  0xd3   :  { %745 = vmatpush.msrb.mxu1 %v571_v36  ;;  %785 = vmatpush.msrb.mxu3 %v635_v49  ;;  %v557_v34 = vunpack.c.h.bf16 %v2636_v6  ;;  %v589_v35 = vunpack.c.h.bf16 %v2638_v7  ;;  %v621_v42 = vunpack.c.h.bf16 %v2645_v17  ;;  %v523_v43 = vunpack.c.h.bf16 %v2648_v22  ;;  %v3257_v49 = vld [vmem:[#allocation35_spill] sm:$0xff] }
  0xd4   :  { %765 = vmatpush.msrb.mxu2 %v603_v46  ;;  %726 = vmatpush.msrb.mxu0 %v537_v50  ;;  %v555_v36 = vunpack.c.h.bf16 %v2650_v23  ;;  %v587_v44 = vunpack.c.h.bf16 %v2652_v27  ;;  %v619_v54 = vunpack.c.h.bf16 %v2659_v41  ;;  %v521_v6 = vunpack.c.h.bf16 %v2661_v45 }
  0xd5   :  { %746 = vmatpush.msrb.mxu1 %v569_v51  ;;  %786 = vmatpush.msrb.mxu3 %v633_v56  ;;  %v553_v7 = vunpack.c.h.bf16 %v2663_v48  ;;  %v585_v17 = vunpack.c.h.bf16 %v2668_v60  ;;  %v617_v22 = vunpack.c.h.bf16 %v2670_v11  ;;  %v519_v23 = vunpack.c.h.bf16 %v2674_v12  ;;  %v3250_v60 = vld [vmem:[#allocation28_spill] sm:$0xff]  ;;  %v3252_v12 = vld [vmem:[#allocation30_spill] sm:$0xff] }
  0xd6   :  { %766 = vmatpush.msrb.mxu2 %v601_v55  ;;  %727 = vmatpush.msrb.mxu0 %v535_v57  ;;  %v551_v27 = vunpack.c.h.bf16 %v2676_v13  ;;  %v583_v18 = vunpack.c.h.bf16 %v2678_v1  ;;  %v615_v45 = vunpack.c.h.bf16 %v2685_v37  ;;  %v517_v11 = vunpack.c.h.bf16 %v3250_v60  ;;  %v3254_v1 = vld [vmem:[#allocation32_spill] sm:$0xff]  ;;  %v3259_v57 = vld [vmem:[#allocation37_spill] sm:$0xff] }
  0xd7   :  { %747 = vmatpush.msrb.mxu1 %v567_v61  ;;  %787 = vmatpush.msrb.mxu3 %v631_v63  ;;  %v549_v39 = vunpack.c.h.bf16 %v3251_v33  ;;  %v581_v13 = vunpack.c.h.bf16 %v3252_v12  ;;  %v613_v32 = vunpack.c.h.bf16 %v3253_v0  ;;  %v515_v37 = vunpack.c.h.bf16 %v3254_v1  ;;  %v3258_v55 = vld [vmem:[#allocation36_spill] sm:$0xff] }
  0xd8   :  { %767 = vmatpush.msrb.mxu2 %v599_v62  ;;  %728 = vmatpush.msrb.mxu0 %v533_v3  ;;  %v547_v8 = vunpack.c.h.bf16 %v3255_v58  ;;  %v579_v46 = vunpack.c.h.bf16 %v3256_v52  ;;  %v611_v50 = vunpack.c.h.bf16 %v3257_v49  ;;  %v513_v56 = vunpack.c.h.bf16 %v3258_v55  ;;  %v3260_v62 = vld [vmem:[#allocation38_spill] sm:$0xff]  ;;  %v3261_v3 = vld [vmem:[#allocation39_spill] sm:$0xff]  ;;  %v880_v1 = vld [vmem:[#allocation7 + $0xf8] sm:$0xff] }
  0xd9   :  { %748 = vmatpush.msrb.mxu1 %v565_v4  ;;  %788 = vmatpush.msrb.mxu3 %v629_v9  ;;  %v545_v61 = vunpack.c.h.bf16 %v3259_v57  ;;  %v577_v63 = vunpack.c.h.bf16 %v3260_v62  ;;  %v609_v4 = vunpack.c.h.bf16 %v3261_v3  ;;  %v543_v9 = vunpack.c.h.bf16 %v2726_v47  ;;  %v879_v49 = vld [vmem:[#allocation7 + $0xf0] sm:$0xff]  ;;  %v877_v3 = vld [vmem:[#allocation7 + $0xe0] sm:$0xff] }
  0xda   :  { %768 = vmatpush.msrb.mxu2 %v597_v5  ;;  %729 = vmatpush.msrb.mxu0 %v531_v10  ;;  %v511_v5 = vunpack.c.h.bf16 %v2724_v28  ;;  %v3262_v10 = vld [vmem:[#allocation40_spill] sm:$0xff]  ;;  %v941_v57 = vunpack.c.l.bf16 %v879_v49  ;;  %v942_v62 = vunpack.c.h.bf16 %v879_v49  ;;  %v870_v49 = vld [vmem:[#allocation7 + $0xa8] sm:$0xff] }
  0xdb   :  { %749 = vmatpush.msrb.mxu1 %v563_v14  ;;  %789 = vmatpush.msrb.mxu3 %v627_v16  ;;  %v575_v14 = vunpack.c.h.bf16 %v3262_v10 }
  0xdc   :  { %769 = vmatpush.msrb.mxu2 %v595_v15  ;;  %730 = vmatpush.msrb.mxu0 %v529_v19  ;;  %v607_v15 = vunpack.c.h.bf16 %v2733_v59  ;;  %v3264_v59 = vld [vmem:[#allocation21_spill] sm:$0xff] }
  0xdd   :  { %750 = vmatpush.msrb.mxu1 %v561_v20  ;;  %790 = vmatpush.msrb.mxu3 %v625_v24  ;;  %v378_v24 = vld [vmem:[#allocation13 + $0x8] sm:$0xf] }
  0xde   :  { %770 = vmatpush.msrb.mxu2 %v593_v21  ;;  %731 = vmatpush.msrb.mxu0 %v527_v25  ;;  %v377_v21 = vld [vmem:[#allocation13 + $0x4] sm:$0xf]  ;;  %v3263_v25 = vld [vmem:[#allocation20_spill] sm:$0xff] }
  0xdf   :  { %751 = vmatpush.msrb.mxu1 %v559_v26  ;;  %791 = vmatpush.msrb.mxu3 %v623_v30 }
  0xe0   :  { %771 = vmatpush.msrb.mxu2 %v591_v29  ;;  %732 = vmatpush.msrb.mxu0 %v525_v31  ;;  %v3265_v29 = vld [vmem:[#allocation22_spill] sm:$0xff]  ;;  %v3266_v31 = vld [vmem:[#allocation23_spill] sm:$0xff] }
  0xe1   :  { %752 = vmatpush.msrb.mxu1 %v557_v34  ;;  %792 = vmatpush.msrb.mxu3 %v621_v42  ;;  %v417_v42 = vperm.slane %v377_v21, 0 }
  0xe2   :  { %772 = vmatpush.msrb.mxu2 %v589_v35  ;;  %733 = vmatpush.msrb.mxu0 %v523_v43  ;;  %v430_v43 = vperm.slane %v378_v24, 0 }
  0xe3   :  { %753 = vmatpush.msrb.mxu1 %v555_v36  ;;  %793 = vmatpush.msrb.mxu3 %v619_v54  ;;  %v418_v36 = vperm.slane %v377_v21, 1  ;;  %v420_v54 = vperm.slane %v377_v21, 3 }
  0xe4   :  { %773 = vmatpush.msrb.mxu2 %v587_v44  ;;  %734 = vmatpush.msrb.mxu0 %v521_v6  ;;  %v419_v44 = vperm.slane %v377_v21, 2 }
  0xe5   :  { %754 = vmatpush.msrb.mxu1 %v553_v7  ;;  %794 = vmatpush.msrb.mxu3 %v617_v22  ;;  %v431_v7 = vperm.slane %v378_v24, 1  ;;  %v433_v22 = vperm.slane %v378_v24, 3 }
  0xe6   :  { %774 = vmatpush.msrb.mxu2 %v585_v17  ;;  %735 = vmatpush.msrb.mxu0 %v519_v23  ;;  %v432_v17 = vperm.slane %v378_v24, 2  ;;  %v938_v24 = vunpack.c.h.bf16 %v877_v3 }
  0xe7   :  { %755 = vmatpush.msrb.mxu1 %v551_v27  ;;  %795 = vmatpush.msrb.mxu3 %v615_v45 }
  0xe8   :  { %775 = vmatpush.msrb.mxu2 %v583_v18  ;;  %736 = vmatpush.msrb.mxu0 %v517_v11 }
  0xe9   :  { %756 = vmatpush.msrb.mxu1 %v549_v39  ;;  %796 = vmatpush.msrb.mxu3 %v613_v32 }
  0xea   :  { %776 = vmatpush.msrb.mxu2 %v581_v13  ;;  %737 = vmatpush.msrb.mxu0 %v515_v37  ;;  %v863_v37 = vld [vmem:[#allocation7 + $0x70] sm:$0xff] }
  0xeb   :  { %757 = vmatpush.msrb.mxu1 %v547_v8  ;;  %797 = vmatpush.msrb.mxu3 %v611_v50  ;;  %v943_v8 = vunpack.c.l.bf16 %v880_v1  ;;  %v862_v50 = vld [vmem:[#allocation7 + $0x68] sm:$0xff] }
  0xec   :  { %777 = vmatpush.msrb.mxu2 %v579_v46  ;;  %738 = vmatpush.msrb.mxu0 %v513_v56  ;;  %v944_v46 = vunpack.c.h.bf16 %v880_v1  ;;  %v909_v56 = vunpack.c.l.bf16 %v863_v37  ;;  %v908_v10 = vunpack.c.h.bf16 %v862_v50 }
  0xed   :  { %758 = vmatpush.msrb.mxu1 %v545_v61  ;;  %798 = vmatpush.msrb.mxu3 %v609_v4  ;;  %v910_v61 = vunpack.c.h.bf16 %v863_v37  ;;  %v638_v4 = vld [vmem:[#allocation13 + $0xc] sm:$0x3] }
  0xee   :  { %778 = vmatpush.msrb.mxu2 %v577_v63  ;;  %739 = vmatpush.msrb.mxu0 %v511_v5  ;;  %v861_v63 = vld [vmem:[#allocation7 + $0x60] sm:$0xff]  ;;  %v907_v5 = vunpack.c.l.bf16 %v862_v50  ;;  %v640_v21 = vperm.slane %v638_v4, 0 }
  0xef   :  { %759 = vmatpush.msrb.mxu1 %v543_v9  ;;  %799 = vmatpush.msrb.mxu3 %v607_v15  ;;  %v860_v15 = vld [vmem:[#allocation7 + $0x58] sm:$0xff] }
  0xf0   :  { %779 = vmatpush.msrb.mxu2 %v575_v14 }
 0x12b   :  { %v383_v53 = vpop.xlane.xlu0 %382 }
 0x12c   :  { %v2776_v2 = vmul.f32 0.001953125, %v383_v53 }
 0x12e   :  { %v395_v48 = vmul.f32 %v2776_v2, %v2776_v2  ;;  %v408_v26 = vsub.f32 %v3263_v25, %v2776_v2  ;;  %v409_v53 = vsub.f32 %v3264_v59, %v2776_v2  ;;  %v410_v30 = vsub.f32 %v3265_v29, %v2776_v2  ;;  %v859_v25 = vld [vmem:[#allocation7 + $0x50] sm:$0xff] }
 0x12f   :  { %v411_v34 = vsub.f32 %v3266_v31, %v2776_v2  ;;  %v903_v59 = vunpack.c.l.bf16 %v860_v15  ;;  %v641_v29 = vperm.slane %v638_v4, 1 }
 0x133   :  { %v392_v41 = vpop.xlane.xlu0 %391 }
 0x134   :  { %v394_v38 = vmul.f32 0.001953125, %v392_v41 }
 0x136   :  { %v396_v40 = vsub.f32 %v394_v38, %v395_v48 }
 0x138   :  { %v397_v51 = vadd.f32 1e-05, %v396_v40  ;;  %v864_v40 = vld [vmem:[#allocation7 + $0x78] sm:$0xff] }
 0x139   :  { %v911_v58 = vunpack.c.l.bf16 %v864_v40  ;;  %v912_v52 = vunpack.c.h.bf16 %v864_v40 }
 0x13a   :  { %2193 = vrsqrt.f32 %v397_v51  ;;  %vm404_vm2 = vweird.f32 %v397_v51 }
 0x140   :  { %v2194_v16 = vpop.eup %2193 }
 0x141   :  { %v399_v19 = vmul.f32 %v2194_v16, %v397_v51  ;;  %vm405_vm1 = vweird.f32 %v2194_v16  ;;  %v878_v51 = vld [vmem:[#allocation7 + $0xe8] sm:$0xff] }
 0x142   :  { %vm406_vm3 = vmor %vm404_vm2, %vm405_vm1  ;;  %v939_v9 = vunpack.c.l.bf16 %v878_v51  ;;  %v940_v14 = vunpack.c.h.bf16 %v878_v51 }
 0x143   :  { %v400_v20 = vmul.f32 %v2194_v16, %v399_v19 }
 0x145   :  { %v401_v28 = vmul.f32 0.5, %v400_v20  ;;  %v905_v20 = vunpack.c.l.bf16 %v861_v63 }
 0x147   :  { %v402_v47 = vsub.f32 1.5, %v401_v28  ;;  %v937_v28 = vunpack.c.l.bf16 %v877_v3  ;;  %v923_v3 = vunpack.c.l.bf16 %v870_v49 }
 0x149   :  { %v403_v35 = vmul.f32 %v2194_v16, %v402_v47  ;;  %v906_v47 = vunpack.c.h.bf16 %v861_v63 }
 0x14b   :  { %v407_v6 = vsel %vm406_vm3, %v2194_v16, %v403_v35  ;;  %v876_v16 = vld [vmem:[#allocation7 + $0xd8] sm:$0xff]  ;;  %v874_v35 = vld [vmem:[#allocation7 + $0xc8] sm:$0xff] }
 0x14c   :  { %v412_v23 = vmul.f32 %v408_v26, %v407_v6  ;;  %v413_v27 = vmul.f32 %v409_v53, %v407_v6  ;;  %v414_v41 = vmul.f32 %v410_v30, %v407_v6  ;;  %v415_v18 = vmul.f32 %v411_v34, %v407_v6  ;;  %v875_v26 = vld [vmem:[#allocation7 + $0xd0] sm:$0xff]  ;;  %v858_v34 = vld [vmem:[#allocation7 + $0x48] sm:$0xff] }
 0x14d   :  { %v935_v53 = vunpack.c.l.bf16 %v876_v16  ;;  %v904_v30 = vunpack.c.h.bf16 %v860_v15  ;;  %v936_v31 = vunpack.c.h.bf16 %v876_v16 }
 0x14e   :  { %v425_v45 = vmul.f32 %v417_v42, %v412_v23  ;;  %v426_v48 = vmul.f32 %v418_v36, %v413_v27  ;;  %v427_v38 = vmul.f32 %v419_v44, %v414_v41  ;;  %v428_v2 = vmul.f32 %v420_v54, %v415_v18  ;;  %v873_v23 = vld [vmem:[#allocation7 + $0xc0] sm:$0xff] }
 0x14f   :  { %v901_v36 = vunpack.c.l.bf16 %v859_v25  ;;  %v933_v44 = vunpack.c.l.bf16 %v875_v26  ;;  %v899_v27 = vunpack.c.l.bf16 %v858_v34  ;;  %v931_v41 = vunpack.c.l.bf16 %v874_v35 }
 0x150   :  { %v438_v60 = vadd.f32 %v430_v43, %v425_v45  ;;  %v439_v11 = vadd.f32 %v431_v7, %v426_v48  ;;  %v440_v33 = vadd.f32 %v432_v17, %v427_v38  ;;  %v441_v39 = vadd.f32 %v433_v22, %v428_v2  ;;  %v857_v22 = vld [vmem:[#allocation7 + $0x40] sm:$0xff]  ;;  %v856_v38 = vld [vmem:[#allocation7 + $0x38] sm:$0xff] }
 0x151   :  { %v902_v7 = vunpack.c.h.bf16 %v859_v25  ;;  %v934_v17 = vunpack.c.h.bf16 %v875_v26  ;;  %v900_v45 = vunpack.c.h.bf16 %v858_v34  ;;  %v932_v48 = vunpack.c.h.bf16 %v874_v35  ;;  %v872_v2 = vld [vmem:[#allocation7 + $0xb8] sm:$0xff]  ;;  %v851_v34 = vld [vmem:[#allocation7 + $0x10] sm:$0xff] }
 0x152   :  { %v442_v12 = vmax.f32 %v438_v60, 0.0  ;;  %v443_v13 = vmax.f32 %v439_v11, 0.0  ;;  %v444_v0 = vmax.f32 %v440_v33, 0.0  ;;  %v445_v32 = vmax.f32 %v441_v39, 0.0  ;;  %v852_v26 = vld [vmem:[#allocation7 + $0x18] sm:$0xff]  ;;  %v867_v35 = vld [vmem:[#allocation7 + $0x90] sm:$0xff] }
 0x153   :  { %v897_v60 = vunpack.c.l.bf16 %v857_v22  ;;  %v929_v11 = vunpack.c.l.bf16 %v873_v23  ;;  %v898_v39 = vunpack.c.h.bf16 %v857_v22  ;;  %v895_v40 = vunpack.c.l.bf16 %v856_v38 }
 0x154   :  { %660 = vmatmul.f32.vlgmr.msra.gmra.mxu0 %v442_v12  ;;  %680 = vmatmul.f32.vlgmr.msra.gmra.mxu1 %v443_v13  ;;  %v927_v1 = vunpack.c.l.bf16 %v872_v2 }
 0x155   :  { %700 = vmatmul.f32.vlgmr.msra.gmra.mxu2 %v444_v0  ;;  %720 = vmatmul.f32.vlgmr.msra.gmra.mxu3 %v445_v32 }
 0x156   :  { %951 = vmatpush.msra.mxu0 %v911_v58  ;;  %971 = vmatpush.msra.mxu1 %v943_v8  ;;  %v896_v8 = vunpack.c.h.bf16 %v856_v38 }
 0x157   :  { %991 = vmatpush.msra.mxu2 %v912_v52  ;;  %1011 = vmatpush.msra.mxu3 %v944_v46  ;;  %v928_v52 = vunpack.c.h.bf16 %v872_v2  ;;  %v854_v46 = vld [vmem:[#allocation7 + $0x28] sm:$0xff]  ;;  %v2825_v2 = vld [vmem:[#allocation9 + $0x78] sm:$0xff] }
 0x158   :  { %952 = vmatpush.msra.mxu0 %v909_v56  ;;  %972 = vmatpush.msra.mxu1 %v941_v57  ;;  %v891_v63 = vunpack.c.l.bf16 %v854_v46 }
 0x159   :  { %992 = vmatpush.msra.mxu2 %v910_v61  ;;  %1012 = vmatpush.msra.mxu3 %v942_v62 }
 0x15a   :  { %953 = vmatpush.msra.mxu0 %v907_v5  ;;  %973 = vmatpush.msra.mxu1 %v939_v9  ;;  %v892_v9 = vunpack.c.h.bf16 %v854_v46  ;;  %v2846_v46 = vld [vmem:[#allocation9 + $0x1f0] sm:$0xff] }
 0x15b   :  { %993 = vmatpush.msra.mxu2 %v908_v10  ;;  %1013 = vmatpush.msra.mxu3 %v940_v14  ;;  %v924_v10 = vunpack.c.h.bf16 %v870_v49  ;;  %v1347_v49 = vunpack.c.l.bf16 %v2846_v46 }
 0x15c   :  { %740 = vmatmul.f32.vlgmr.msrb.gmra.mxu0 %v442_v12  ;;  %760 = vmatmul.f32.vlgmr.msrb.gmra.mxu1 %v443_v13  ;;  %v930_v12 = vunpack.c.h.bf16 %v873_v23  ;;  %v855_v13 = vld [vmem:[#allocation7 + $0x30] sm:$0xff] }
 0x15d   :  { %780 = vmatmul.f32.vlgmr.msrb.gmra.mxu2 %v444_v0  ;;  %800 = vmatmul.f32.vlgmr.msrb.gmra.mxu3 %v445_v32  ;;  %v871_v0 = vld [vmem:[#allocation7 + $0xb0] sm:$0xff]  ;;  %v893_v51 = vunpack.c.l.bf16 %v855_v13  ;;  %v894_v57 = vunpack.c.h.bf16 %v855_v13 }
 0x15e   :  { %954 = vmatpush.msra.mxu0 %v905_v20  ;;  %974 = vmatpush.msra.mxu1 %v937_v28  ;;  %v926_v61 = vunpack.c.h.bf16 %v871_v0  ;;  %v853_v20 = vld [vmem:[#allocation7 + $0x20] sm:$0xff] }
 0x15f   :  { %994 = vmatpush.msra.mxu2 %v906_v47  ;;  %1014 = vmatpush.msra.mxu3 %v938_v24  ;;  %v869_v28 = vld [vmem:[#allocation7 + $0xa0] sm:$0xff]  ;;  %v890_v24 = vunpack.c.h.bf16 %v853_v20 }
 0x160   :  { %955 = vmatpush.msra.mxu0 %v903_v59  ;;  %975 = vmatpush.msra.mxu1 %v935_v53  ;;  %v921_v47 = vunpack.c.l.bf16 %v869_v28  ;;  %v922_v25 = vunpack.c.h.bf16 %v869_v28  ;;  %v868_v59 = vld [vmem:[#allocation7 + $0x98] sm:$0xff]  ;;  %v887_v53 = vunpack.c.l.bf16 %v852_v26 }
 0x161   :  { %995 = vmatpush.msra.mxu2 %v904_v30  ;;  %1015 = vmatpush.msra.mxu3 %v936_v31  ;;  %v888_v30 = vunpack.c.h.bf16 %v852_v26  ;;  %v920_v31 = vunpack.c.h.bf16 %v868_v59  ;;  %v2873_v28 = vld [vmem:[#allocation9 + $0x58] sm:$0xff] }
 0x162   :  { %956 = vmatpush.msra.mxu0 %v901_v36  ;;  %976 = vmatpush.msra.mxu1 %v933_v44  ;;  %v886_v36 = vunpack.c.h.bf16 %v851_v34  ;;  %v918_v44 = vunpack.c.h.bf16 %v867_v35 }
 0x163   :  { %996 = vmatpush.msra.mxu2 %v902_v7  ;;  %1016 = vmatpush.msra.mxu3 %v934_v17 }
 0x164   :  { %957 = vmatpush.msra.mxu0 %v899_v27  ;;  %977 = vmatpush.msra.mxu1 %v931_v41  ;;  %v849_v27 = vld [vmem:[#allocation7] sm:$0xff] }
 0x165   :  { %997 = vmatpush.msra.mxu2 %v900_v45  ;;  %1017 = vmatpush.msra.mxu3 %v932_v48  ;;  %v865_v41 = vld [vmem:[#allocation7 + $0x80] sm:$0xff]  ;;  %v882_v48 = vunpack.c.h.bf16 %v849_v27 }
 0x166   :  { %958 = vmatpush.msra.mxu0 %v897_v60  ;;  %978 = vmatpush.msra.mxu1 %v929_v11  ;;  %v913_v45 = vunpack.c.l.bf16 %v865_v41  ;;  %v914_v38 = vunpack.c.h.bf16 %v865_v41  ;;  %v2827_v60 = vld [vmem:[#allocation9 + $0xf8] sm:$0xff]  ;;  %v2908_v41 = vld [vmem:[#allocation9 + $0x1c8] sm:$0xff] }
 0x167   :  { %998 = vmatpush.msra.mxu2 %v898_v39  ;;  %1018 = vmatpush.msra.mxu3 %v930_v12  ;;  %v2829_v11 = vld [vmem:[#allocation9 + $0x178] sm:$0xff]  ;;  %v1253_v39 = vunpack.c.l.bf16 %v2825_v2  ;;  %v1285_v12 = vunpack.c.l.bf16 %v2827_v60 }
 0x168   :  { %959 = vmatpush.msra.mxu0 %v895_v40  ;;  %979 = vmatpush.msra.mxu1 %v927_v1  ;;  %v1317_v13 = vunpack.c.l.bf16 %v2829_v11  ;;  %v2837_v40 = vld [vmem:[#allocation9 + $0x70] sm:$0xff] }
 0x169   :  { %999 = vmatpush.msra.mxu2 %v896_v8  ;;  %1019 = vmatpush.msra.mxu3 %v928_v52  ;;  %v2839_v1 = vld [vmem:[#allocation9 + $0xf0] sm:$0xff] }
 0x16a   :  { %960 = vmatpush.msra.mxu0 %v893_v51  ;;  %v1283_v8 = vunpack.c.l.bf16 %v2839_v1  ;;  %v2851_v51 = vld [vmem:[#allocation9 + $0xe8] sm:$0xff] }
 0x16b   :  { %1000 = vmatpush.msra.mxu2 %v894_v57  ;;  %1020 = vmatpush.msra.mxu3 %v926_v61  ;;  %v1281_v57 = vunpack.c.l.bf16 %v2851_v51 }
 0x16c   :  { %961 = vmatpush.msra.mxu0 %v891_v63 }
 0x16d   :  { %1001 = vmatpush.msra.mxu2 %v892_v9  ;;  %1021 = vmatpush.msra.mxu3 %v924_v10  ;;  %v2863_v9 = vld [vmem:[#allocation9 + $0xe0] sm:$0xff] }
 0x16e   :  { %v2865_v10 = vld [vmem:[#allocation9 + $0x160] sm:$0xff] }
 0x16f   :  { %1002 = vmatpush.msra.mxu2 %v890_v24  ;;  %1022 = vmatpush.msra.mxu3 %v922_v25  ;;  %v1245_v24 = vunpack.c.l.bf16 %v2873_v28 }
 0x171   :  { %1003 = vmatpush.msra.mxu2 %v888_v30  ;;  %1023 = vmatpush.msra.mxu3 %v920_v31  ;;  %v2887_v30 = vld [vmem:[#allocation9 + $0x50] sm:$0xff] }
 0x172   :  { %v2889_v31 = vld [vmem:[#allocation9 + $0xd0] sm:$0xff] }
 0x173   :  { %1004 = vmatpush.msra.mxu2 %v886_v36  ;;  %1024 = vmatpush.msra.mxu3 %v918_v44  ;;  %v2896_v44 = vld [vmem:[#allocation9 + $0x1d0] sm:$0xff] }
 0x1d1   :  { %v661_v55 = vpop.f32.mrf.mxu0  ;;  %v681_v19 = vpop.f32.mrf.mxu1 }
 0x1d2   :  { %v662_v54 = vadd.f32 %v661_v55, %v640_v21  ;;  %v925_v55 = vunpack.c.l.bf16 %v871_v0  ;;  %v889_v21 = vunpack.c.l.bf16 %v853_v20  ;;  %v2834_v0 = vld [vmem:[#allocation9 + $0x1f8] sm:$0xff] }
 0x1d4   :  { %v682_v33 = vadd.f32 %v681_v19, %v662_v54  ;;  %980 = vmatpush.msra.mxu1 %v925_v55  ;;  %962 = vmatpush.msra.mxu0 %v889_v21  ;;  %v850_v54 = vld [vmem:[#allocation7 + $0x8] sm:$0xff]  ;;  %v2875_v21 = vld [vmem:[#allocation9 + $0xd8] sm:$0xff] }
 0x1d5   :  { %v883_v7 = vunpack.c.l.bf16 %v850_v54  ;;  %v884_v22 = vunpack.c.h.bf16 %v850_v54  ;;  %v2853_v55 = vld [vmem:[#allocation9 + $0x168] sm:$0xff]  ;;  %v1277_v25 = vunpack.c.l.bf16 %v2875_v21  ;;  %v1339_v54 = vunpack.c.l.bf16 %v2896_v44 }
 0x1d6   :  { %981 = vmatpush.msra.mxu1 %v923_v3  ;;  %963 = vmatpush.msra.mxu0 %v887_v53  ;;  %v1313_v61 = vunpack.c.l.bf16 %v2853_v55  ;;  %v2861_v3 = vld [vmem:[#allocation9 + $0x60] sm:$0xff] }
 0x1d7   :  { %1005 = vmatpush.msra.mxu2 %v884_v22 }
 0x1d8   :  { %v701_v42 = vpop.f32.mrf.mxu2  ;;  %v2812_v43 = vpop.f32.mrf.mxu3  ;;  %982 = vmatpush.msra.mxu1 %v921_v47  ;;  %v2877_v47 = vld [vmem:[#allocation9 + $0x158] sm:$0xff] }
 0x1d9   :  { %v741_v6 = vpop.f32.mrf.mxu0  ;;  %v761_v32 = vpop.f32.mrf.mxu1  ;;  %v702_v37 = vadd.f32 %v701_v42, %v682_v33  ;;  %v885_v42 = vunpack.c.l.bf16 %v851_v34  ;;  %1006 = vmatpush.msra.mxu2 %v882_v48  ;;  %v1309_v26 = vunpack.c.l.bf16 %v2877_v47  ;;  %v2891_v34 = vld [vmem:[#allocation9 + $0x150] sm:$0xff]  ;;  %v1337_v48 = vunpack.c.l.bf16 %v2908_v41 }
 0x1da   :  { %v742_v18 = vadd.f32 %v741_v6, %v641_v29  ;;  %v919_v29 = vunpack.c.l.bf16 %v868_v59  ;;  %v866_v6 = vld [vmem:[#allocation7 + $0x88] sm:$0xff]  ;;  %v1096_v33 = vpop.xlane.xlu2 %1095  ;;  %v2882_v59 = vld [vmem:[#allocation9 + $0x1d8] sm:$0xff]  ;;  %v1307_v36 = vunpack.c.l.bf16 %v2891_v34 }
 0x1db   :  { %v2815_v4 = vadd.f32 %v2812_v43, %v702_v37  ;;  %v917_v43 = vunpack.c.l.bf16 %v867_v35  ;;  %v915_v17 = vunpack.c.l.bf16 %v866_v6  ;;  %v916_v23 = vunpack.c.h.bf16 %v866_v6  ;;  %964 = vmatpush.msra.mxu0 %v885_v42  ;;  %v2841_v37 = vld [vmem:[#allocation9 + $0x170] sm:$0xff]  ;;  %1397 = vmatpush.msrb.mxu2 %v1317_v13  ;;  %v2899_v6 = vld [vmem:[#allocation9 + $0x48] sm:$0xff] }
 0x1dc   :  { %v762_v58 = vadd.f32 %v761_v32, %v742_v18  ;;  %983 = vmatpush.msra.mxu1 %v919_v29  ;;  %v881_v18 = vunpack.c.l.bf16 %v849_v27  ;;  %v1349_v32 = vunpack.c.l.bf16 %v2834_v0  ;;  %v1315_v52 = vunpack.c.l.bf16 %v2841_v37 }
 0x1dd   :  { %v809_v16 = vmul.f32 %v2815_v4, %v2815_v4  ;;  %965 = vmatpush.msra.mxu0 %v883_v7  ;;  %1025 = vmatpush.msra.mxu3 %v916_v23  ;;  %v2884_v53 = vmul.f32 0.001953125, %v1096_v33  ;;  %v1341_v29 = vunpack.c.l.bf16 %v2882_v59  ;;  %v1243_v42 = vunpack.c.l.bf16 %v2887_v30  ;;  %v2901_v7 = vld [vmem:[#allocation9 + $0xc8] sm:$0xff]  ;;  %v2915_v33 = vld [vmem:[#allocation9 + $0xc0] sm:$0xff] }
 0x1de   :  { %984 = vmatpush.msra.mxu1 %v917_v43  ;;  %1398 = vmatpush.msrb.mxu2 %v1315_v52  ;;  %v1275_v43 = vunpack.c.l.bf16 %v2889_v31  ;;  %v1241_v22 = vunpack.c.l.bf16 %v2899_v6  ;;  %v1273_v23 = vunpack.c.l.bf16 %v2901_v7  ;;  %v1271_v13 = vunpack.c.l.bf16 %v2915_v33  ;;  %v2925_v52 = vld [vmem:[#allocation9 + $0x38] sm:$0xff] }
 0x1df   :  { %966 = vmatpush.msra.mxu0 %v881_v18  ;;  %1026 = vmatpush.msra.mxu3 %v914_v38  ;;  %v1108_v18 = vmul.f32 %v2884_v53, %v2884_v53  ;;  %v2913_v38 = vld [vmem:[#allocation9 + $0x40] sm:$0xff]  ;;  %3267 = vst [vmem:[#allocation28_spill] sm:$0xff] %v2925_v52 }
 0x1e0   :  { %v781_v50 = vpop.f32.mrf.mxu2  ;;  %v801_v62 = vpop.f32.mrf.mxu3  ;;  %985 = vmatpush.msra.mxu1 %v915_v17  ;;  %1399 = vmatpush.msrb.mxu2 %v1313_v61  ;;  %v2903_v17 = vld [vmem:[#allocation9 + $0x148] sm:$0xff] }
 0x1e1   :  { %v782_v56 = vadd.f32 %v781_v50, %v762_v58  ;;  %v1251_v58 = vunpack.c.l.bf16 %v2837_v40  ;;  %1357 = vmatpush.msrb.mxu0 %v1253_v39  ;;  %v2849_v50 = vld [vmem:[#allocation9 + $0x68] sm:$0xff]  ;;  %1417 = vmatpush.msrb.mxu3 %v1349_v32  ;;  %v1305_v27 = vunpack.c.l.bf16 %v2903_v17  ;;  %v2917_v39 = vld [vmem:[#allocation9 + $0x140] sm:$0xff] }
 0x1e2   :  { %986 = vmatpush.msra.mxu1 %v913_v45  ;;  %v1105_v35 = vpop.xlane.xlu2 %1104  ;;  %v1303_v32 = vunpack.c.l.bf16 %v2917_v39 }
 0x1e3   :  { %v2817_v5 = vadd.f32 %v801_v62, %v782_v56  ;;  %v1249_v56 = vunpack.c.l.bf16 %v2849_v50  ;;  %v2858_v62 = vld [vmem:[#allocation9 + $0x1e8] sm:$0xff]  ;;  %1358 = vmatpush.msrb.mxu0 %v1251_v58  ;;  %1418 = vmatpush.msrb.mxu3 %v1347_v49  ;;  %v1107_v45 = vmul.f32 0.001953125, %v1105_v35  ;;  %v2922_v58 = vld [vmem:[#allocation9 + $0x1c0] sm:$0xff]  ;;  %v2927_v49 = vld [vmem:[#allocation9 + $0xb8] sm:$0xff] }
 0x1e4   :  { %1377 = vmatpush.msrb.mxu1 %v1285_v12  ;;  %v1345_v63 = vunpack.c.l.bf16 %v2858_v62  ;;  %v1239_v12 = vunpack.c.l.bf16 %v2913_v38  ;;  %3268 = vst [vmem:[#allocation29_spill] sm:$0xff] %v2927_v49  ;;  %v1269_v61 = vunpack.c.l.bf16 %v2927_v49 }
 0x1e5   :  { %v806_v14 = vadd.f32 %v2817_v5, %v2815_v4  ;;  %v810_v15 = vmul.f32 %v2817_v5, %v2817_v5  ;;  %1359 = vmatpush.msrb.mxu0 %v1249_v56  ;;  %v2929_v56 = vld [vmem:[#allocation9 + $0x138] sm:$0xff] }
 0x1e6   :  { %1378 = vmatpush.msrb.mxu1 %v1283_v8  ;;  %1419 = vmatpush.msrb.mxu3 %v1345_v63  ;;  %v1335_v8 = vunpack.c.l.bf16 %v2922_v58  ;;  %3269 = vst [vmem:[#allocation30_spill] sm:$0xff] %v2929_v56  ;;  %v1301_v63 = vunpack.c.l.bf16 %v2929_v56 }
 0x1e7   :  { %807 = vadd.xlane.f32.xlu1 %v806_v14  ;;  %v811_v19 = vadd.f32 %v810_v15, %v809_v16  ;;  %v1247_v14 = vunpack.c.l.bf16 %v2861_v3  ;;  %v1279_v15 = vunpack.c.l.bf16 %v2863_v9  ;;  %v1311_v16 = vunpack.c.l.bf16 %v2865_v10 }
 0x1e8   :  { %1379 = vmatpush.msrb.mxu1 %v1281_v57  ;;  %v1237_v57 = vunpack.c.l.bf16 %v2925_v52 }
 0x1e9   :  { %1360 = vmatpush.msrb.mxu0 %v1247_v14  ;;  %1400 = vmatpush.msrb.mxu2 %v1311_v16  ;;  %v2934_v14 = vld [vmem:[#allocation9 + $0x1b8] sm:$0xff] }
 0x1ea   :  { %1380 = vmatpush.msrb.mxu1 %v1279_v15  ;;  %3270 = vst [vmem:[#allocation31_spill] sm:$0xff] %v2934_v14  ;;  %v1109_v15 = vsub.f32 %v1107_v45, %v1108_v18  ;;  %v1333_v16 = vunpack.c.l.bf16 %v2934_v14  ;;  %v2958_v45 = vld [vmem:[#allocation9 + $0x1a8] sm:$0xff] }
 0x1eb   :  { %1361 = vmatpush.msrb.mxu0 %v1245_v24  ;;  %1401 = vmatpush.msrb.mxu2 %v1309_v26  ;;  %v2939_v24 = vld [vmem:[#allocation9 + $0xb0] sm:$0xff]  ;;  %3278 = vst [vmem:[#allocation39_spill] sm:$0xff] %v2958_v45 }
 0x1ec   :  { %1381 = vmatpush.msrb.mxu1 %v1277_v25  ;;  %3272 = vst [vmem:[#allocation33_spill] sm:$0xff] %v2939_v24  ;;  %v2941_v25 = vld [vmem:[#allocation9 + $0x130] sm:$0xff] }
 0x1ed   :  { %1362 = vmatpush.msrb.mxu0 %v1243_v42  ;;  %1402 = vmatpush.msrb.mxu2 %v1307_v36  ;;  %3273 = vst [vmem:[#allocation34_spill] sm:$0xff] %v2941_v25  ;;  %v1299_v35 = vunpack.c.l.bf16 %v2941_v25  ;;  %v2946_v42 = vld [vmem:[#allocation9 + $0x1b0] sm:$0xff]  ;;  %v2949_v36 = vld [vmem:[#allocation9 + $0x28] sm:$0xff] }
 0x1ee   :  { %1382 = vmatpush.msrb.mxu1 %v1275_v43  ;;  %3274 = vst [vmem:[#allocation35_spill] sm:$0xff] %v2946_v42  ;;  %v1331_v43 = vunpack.c.l.bf16 %v2946_v42 }
 0x1ef   :  { %812 = vadd.xlane.f32.xlu1 %v811_v19  ;;  %v2870_v19 = vld [vmem:[#allocation9 + $0x1e0] sm:$0xff]  ;;  %1363 = vmatpush.msrb.mxu0 %v1241_v22  ;;  %3275 = vst [vmem:[#allocation36_spill] sm:$0xff] %v2949_v36  ;;  %v2953_v22 = vld [vmem:[#allocation9 + $0x128] sm:$0xff] }
 0x1f0   :  { %v1343_v20 = vunpack.c.l.bf16 %v2870_v19  ;;  %1383 = vmatpush.msrb.mxu1 %v1273_v23  ;;  %1403 = vmatpush.msrb.mxu2 %v1305_v27  ;;  %3277 = vst [vmem:[#allocation38_spill] sm:$0xff] %v2953_v22  ;;  %v1233_v23 = vunpack.c.l.bf16 %v2949_v36  ;;  %v1297_v18 = vunpack.c.l.bf16 %v2953_v22  ;;  %v3004_v22 = vld [vmem:[#allocation9 + $0x108] sm:$0xff] }
 0x1f1   :  { %1364 = vmatpush.msrb.mxu0 %v1239_v12  ;;  %v1329_v12 = vunpack.c.l.bf16 %v2958_v45  ;;  %v2979_v45 = vld [vmem:[#allocation9 + $0x118] sm:$0xff]  ;;  %3293 = vst [vmem:[#allocation50_spill] sm:$0xff] %v3004_v22 }
 0x1f2   :  { %1420 = vmatpush.msrb.mxu3 %v1343_v20  ;;  %1384 = vmatpush.msrb.mxu1 %v1271_v13  ;;  %v2937_v20 = vld [vmem:[#allocation9 + $0x30] sm:$0xff]  ;;  %v2963_v13 = vld [vmem:[#allocation9 + $0x20] sm:$0xff]  ;;  %3285 = vst [vmem:[#allocation42_spill] sm:$0xff] %v2979_v45 }
 0x1f3   :  { %3271 = vst [vmem:[#allocation32_spill] sm:$0xff] %v2937_v20  ;;  %1404 = vmatpush.msrb.mxu2 %v1303_v32  ;;  %v1235_v26 = vunpack.c.l.bf16 %v2937_v20  ;;  %1365 = vmatpush.msrb.mxu0 %v1237_v57  ;;  %v2965_v32 = vld [vmem:[#allocation9 + $0xa0] sm:$0xff]  ;;  %v1231_v57 = vunpack.c.l.bf16 %v2963_v13 }
 0x1f4   :  { %1421 = vmatpush.msrb.mxu3 %v1341_v29  ;;  %v1267_v29 = vunpack.c.l.bf16 %v2939_v24  ;;  %1385 = vmatpush.msrb.mxu1 %v1269_v61  ;;  %3279 = vst [vmem:[#allocation40_spill] sm:$0xff] %v2963_v13  ;;  %v1263_v61 = vunpack.c.l.bf16 %v2965_v32  ;;  %v2984_v13 = vld [vmem:[#allocation9 + $0x198] sm:$0xff] }
 0x1f5   :  { %1405 = vmatpush.msrb.mxu2 %v1301_v63  ;;  %1366 = vmatpush.msrb.mxu0 %v1235_v26  ;;  %3280 = vst [vmem:[#allocation20_spill] sm:$0xff] %v2965_v32  ;;  %v2975_v26 = vld [vmem:[#allocation9 + $0x18] sm:$0xff] }
 0x1f6   :  { %1422 = vmatpush.msrb.mxu3 %v1339_v54  ;;  %v2951_v54 = vld [vmem:[#allocation9 + $0xa8] sm:$0xff]  ;;  %1386 = vmatpush.msrb.mxu1 %v1267_v29  ;;  %3283 = vst [vmem:[#allocation23_spill] sm:$0xff] %v2975_v26  ;;  %v2977_v29 = vld [vmem:[#allocation9 + $0x98] sm:$0xff] }
 0x1f7   :  { %3276 = vst [vmem:[#allocation37_spill] sm:$0xff] %v2951_v54  ;;  %v1265_v27 = vunpack.c.l.bf16 %v2951_v54  ;;  %1406 = vmatpush.msrb.mxu2 %v1299_v35  ;;  %1367 = vmatpush.msrb.mxu0 %v1233_v23  ;;  %v1261_v32 = vunpack.c.l.bf16 %v2977_v29  ;;  %v1325_v23 = vunpack.c.l.bf16 %v2984_v13 }
 0x1f8   :  { %1423 = vmatpush.msrb.mxu3 %v1337_v48  ;;  %v2960_v48 = vadd.f32 1e-05, %v1109_v15  ;;  %v2972_v15 = vld [vmem:[#allocation9 + $0x1a0] sm:$0xff]  ;;  %3284 = vst [vmem:[#allocation41_spill] sm:$0xff] %v2977_v29 }
 0x1f9   :  { %3282 = vst [vmem:[#allocation22_spill] sm:$0xff] %v2972_v15  ;;  %1387 = vmatpush.msrb.mxu1 %v1265_v27  ;;  %1407 = vmatpush.msrb.mxu2 %v1297_v18  ;;  %v2988_v27 = vld [vmem:[#allocation9 + $0x10] sm:$0xff] }
 0x1fa   :  { %1424 = vmatpush.msrb.mxu3 %v1335_v8  ;;  %v2967_v8 = vld [vmem:[#allocation9 + $0x120] sm:$0xff]  ;;  %3286 = vst [vmem:[#allocation43_spill] sm:$0xff] %v2984_v13  ;;  %2195 = vrsqrt.f32 %v2960_v48  ;;  %1368 = vmatpush.msrb.mxu0 %v1231_v57  ;;  %v2992_v18 = vld [vmem:[#allocation9 + $0x110] sm:$0xff]  ;;  %v2999_v57 = vld [vmem:[#allocation9 + $0x8] sm:$0xff]  ;;  %vm1117_vm4 = vweird.f32 %v2960_v48 }
 0x1fb   :  { %3281 = vst [vmem:[#allocation21_spill] sm:$0xff] %v2967_v8  ;;  %v1295_v63 = vunpack.c.l.bf16 %v2967_v8  ;;  %v1293_v8 = vunpack.c.l.bf16 %v2979_v45  ;;  %1388 = vmatpush.msrb.mxu1 %v1263_v61  ;;  %v1291_v29 = vunpack.c.l.bf16 %v2992_v18  ;;  %v3001_v61 = vld [vmem:[#allocation9 + $0x88] sm:$0xff] }
 0x1fc   :  { %1425 = vmatpush.msrb.mxu3 %v1333_v16  ;;  %v1327_v16 = vunpack.c.l.bf16 %v2972_v15  ;;  %3287 = vst [vmem:[#allocation44_spill] sm:$0xff] %v2988_v27  ;;  %v2990_v15 = vld [vmem:[#allocation9 + $0x90] sm:$0xff] }
 0x1fd   :  { %3288 = vst [vmem:[#allocation45_spill] sm:$0xff] %v2990_v15  ;;  %1408 = vmatpush.msrb.mxu2 %v1295_v63  ;;  %v1259_v45 = vunpack.c.l.bf16 %v2990_v15  ;;  %1389 = vmatpush.msrb.mxu1 %v1261_v32  ;;  %v3006_v63 = vld [vmem:[#allocation9 + $0x188] sm:$0xff]  ;;  %v1257_v15 = vunpack.c.l.bf16 %v3001_v61  ;;  %v3016_v32 = vld [vmem:[#allocation9 + $0x100] sm:$0xff] }
 0x1fe   :  { %1426 = vmatpush.msrb.mxu3 %v1331_v43  ;;  %v1229_v43 = vunpack.c.l.bf16 %v2975_v26  ;;  %3289 = vst [vmem:[#allocation46_spill] sm:$0xff] %v2992_v18  ;;  %v2997_v26 = vld [vmem:[#allocation9 + $0x190] sm:$0xff]  ;;  %v1225_v18 = vunpack.c.l.bf16 %v2999_v57  ;;  %v1321_v54 = vunpack.c.l.bf16 %v3006_v63 }
 0x1ff   :  { %3290 = vst [vmem:[#allocation47_spill] sm:$0xff] %v2997_v26  ;;  %v1323_v13 = vunpack.c.l.bf16 %v2997_v26  ;;  %1409 = vmatpush.msrb.mxu2 %v1293_v8  ;;  %v3018_v26 = vld [vmem:[#allocation9 + $0x180] sm:$0xff]  ;;  %1390 = vmatpush.msrb.mxu1 %v1259_v45 }
 0x200   :  { %1427 = vmatpush.msrb.mxu3 %v1329_v12  ;;  %v1227_v12 = vunpack.c.l.bf16 %v2988_v27  ;;  %3291 = vst [vmem:[#allocation48_spill] sm:$0xff] %v2999_v57  ;;  %1369 = vmatpush.msrb.mxu0 %v1229_v43  ;;  %v1289_v27 = vunpack.c.l.bf16 %v3004_v22  ;;  %v3014_v43 = vld [vmem:[#allocation9 + $0x80] sm:$0xff]  ;;  %v1319_v22 = vunpack.c.l.bf16 %v3018_v26 }
 0x201   :  { %3292 = vst [vmem:[#allocation49_spill] sm:$0xff] %v3001_v61  ;;  %1410 = vmatpush.msrb.mxu2 %v1291_v29  ;;  %v1287_v61 = vunpack.c.l.bf16 %v3016_v32  ;;  %1391 = vmatpush.msrb.mxu1 %v1257_v15 }
 0x202   :  { %1428 = vmatpush.msrb.mxu3 %v1327_v16  ;;  %3294 = vst [vmem:[#allocation51_spill] sm:$0xff] %v3006_v63  ;;  %v3008_v16 = vld [vmem:[#allocation9] sm:$0xff]  ;;  %1370 = vmatpush.msrb.mxu0 %v1227_v12  ;;  %v2196_v63 = vpop.eup %2195 }
 0x203   :  { %3295 = vst [vmem:[#allocation52_spill] sm:$0xff] %v3008_v16  ;;  %v1223_v8 = vunpack.c.l.bf16 %v3008_v16  ;;  %1411 = vmatpush.msrb.mxu2 %v1289_v27  ;;  %v1112_v45 = vmul.f32 %v2196_v63, %v2960_v48  ;;  %vm1118_vm5 = vweird.f32 %v2196_v63 }
 0x204   :  { %1429 = vmatpush.msrb.mxu3 %v1325_v23  ;;  %3296 = vst [vmem:[#allocation53_spill] sm:$0xff] %v3014_v43  ;;  %v1255_v23 = vunpack.c.l.bf16 %v3014_v43  ;;  %1371 = vmatpush.msrb.mxu0 %v1225_v18  ;;  %vm1119_vm6 = vmor %vm1117_vm4, %vm1118_vm5 }
 0x205   :  { %3297 = vst [vmem:[#allocation54_spill] sm:$0xff] %v3016_v32  ;;  %1412 = vmatpush.msrb.mxu2 %v1287_v61  ;;  %v1113_v12 = vmul.f32 %v2196_v63, %v1112_v45 }
 0x206   :  { %3298 = vst [vmem:[#allocation55_spill] sm:$0xff] %v3018_v26  ;;  %1430 = vmatpush.msrb.mxu3 %v1323_v13  ;;  %1372 = vmatpush.msrb.mxu0 %v1223_v8  ;;  %v804_v8 = vld [vmem:[#allocation13 + $0xe] sm:$0x3] }
 0x207   :  { %1392 = vmatpush.msrb.mxu1 %v1255_v23  ;;  %v1114_v32 = vmul.f32 0.5, %v1113_v12  ;;  %v834_v48 = vperm.slane %v804_v8, 0  ;;  %v3300_v12 = vld [vmem:[#allocation25_spill] sm:$0xff] }
 0x208   :  { %1431 = vmatpush.msrb.mxu3 %v1321_v54 }
 0x209   :  { %v1115_v43 = vsub.f32 1.5, %v1114_v32 }
 0x20a   :  { %1432 = vmatpush.msrb.mxu3 %v1319_v22  ;;  %v3299_v22 = vld [vmem:[#allocation24_spill] sm:$0xff] }
 0x20b   :  { %v1116_v15 = vmul.f32 %v2196_v63, %v1115_v43  ;;  %v1090_v43 = vld [vmem:[#allocation13 + $0x1c] sm:$0xf] }
 0x20c   :  { %v1131_v14 = vperm.slane %v1090_v43, 1  ;;  %v1132_v52 = vperm.slane %v1090_v43, 2 }
 0x20d   :  { %v1120_v61 = vsel %vm1119_vm6, %v2196_v63, %v1116_v15 }
 0x25a   :  { %v808_v35 = vpop.xlane.xlu1 %807 }
 0x25b   :  { %v814_v36 = vmul.f32 0.00390625, %v808_v35 }
 0x25d   :  { %v816_v42 = vmul.f32 %v814_v36, %v814_v36  ;;  %v829_v32 = vsub.f32 %v2815_v4, %v814_v36  ;;  %v830_v45 = vsub.f32 %v2817_v5, %v814_v36  ;;  %v1130_v5 = vperm.slane %v1090_v43, 0 }
 0x262   :  { %v813_v57 = vpop.xlane.xlu1 %812 }
 0x263   :  { %v815_v35 = vmul.f32 0.00390625, %v813_v57 }
 0x265   :  { %v817_v29 = vsub.f32 %v815_v35, %v816_v42  ;;  %v1121_v42 = vsub.f32 %v3299_v22, %v2884_v53  ;;  %v805_v35 = vld [vmem:[#allocation13 + $0x10] sm:$0x3] }
 0x266   :  { %v841_v15 = vperm.slane %v805_v35, 0 }
 0x267   :  { %v818_v13 = vadd.f32 1e-05, %v817_v29  ;;  %v835_v29 = vperm.slane %v804_v8, 1  ;;  %v1125_v25 = vmul.f32 %v1121_v42, %v1120_v61  ;;  %v1091_v8 = vld [vmem:[#allocation13 + $0x20] sm:$0xf]  ;;  %v1318_v42 = vunpack.c.h.bf16 %v2829_v11 }
 0x268   :  { %v1146_v11 = vperm.slane %v1091_v8, 3 }
 0x269   :  { %2197 = vrsqrt.f32 %v818_v13  ;;  %vm825_vm8 = vweird.f32 %v818_v13 }
 0x26f   :  { %v2198_v26 = vpop.eup %2197 }
 0x270   :  { %v820_v18 = vmul.f32 %v2198_v26, %v818_v13  ;;  %vm826_vm7 = vweird.f32 %v2198_v26  ;;  %v842_v13 = vperm.slane %v805_v35, 1 }
 0x271   :  { %vm827_vm9 = vmor %vm825_vm8, %vm826_vm7 }
 0x272   :  { %v821_v54 = vmul.f32 %v2198_v26, %v820_v18  ;;  %v1122_v18 = vsub.f32 %v3300_v12, %v2884_v53 }
 0x274   :  { %v822_v27 = vmul.f32 0.5, %v821_v54  ;;  %v3301_v54 = vld [vmem:[#allocation26_spill] sm:$0xff]  ;;  %v1126_v20 = vmul.f32 %v1122_v18, %v1120_v61  ;;  %v1144_v18 = vperm.slane %v1091_v8, 1 }
 0x276   :  { %v823_v57 = vsub.f32 1.5, %v822_v27  ;;  %v1123_v27 = vsub.f32 %v3301_v54, %v2884_v53  ;;  %v1138_v54 = vmul.f32 %v1130_v5, %v1125_v25  ;;  %v1284_v25 = vunpack.c.h.bf16 %v2839_v1  ;;  %v3304_v5 = vld [vmem:[#allocation29_spill] sm:$0xff] }
 0x277   :  { %v1346_v1 = vunpack.c.h.bf16 %v2858_v62 }
 0x278   :  { %v824_v23 = vmul.f32 %v2198_v26, %v823_v57  ;;  %v3302_v57 = vld [vmem:[#allocation27_spill] sm:$0xff]  ;;  %v1127_v49 = vmul.f32 %v1123_v27, %v1120_v61 }
 0x279   :  { %v1124_v4 = vsub.f32 %v3302_v57, %v2884_v53  ;;  %v1286_v53 = vunpack.c.h.bf16 %v2827_v60  ;;  %v1348_v60 = vunpack.c.h.bf16 %v2846_v46  ;;  %v1280_v46 = vunpack.c.h.bf16 %v2863_v9 }
 0x27a   :  { %v828_v16 = vsel %vm827_vm9, %v2198_v26, %v824_v23  ;;  %v1143_v26 = vperm.slane %v1091_v8, 0  ;;  %v1246_v9 = vunpack.c.h.bf16 %v2873_v28  ;;  %v1244_v28 = vunpack.c.h.bf16 %v2887_v30 }
 0x27b   :  { %v831_v22 = vmul.f32 %v829_v32, %v828_v16  ;;  %v832_v63 = vmul.f32 %v830_v45, %v828_v16  ;;  %v1128_v23 = vmul.f32 %v1124_v4, %v1120_v61  ;;  %v1133_v16 = vperm.slane %v1090_v43, 3 }
 0x27c   :  { %v1254_v45 = vunpack.c.h.bf16 %v2825_v2  ;;  %v1140_v61 = vmul.f32 %v1132_v52, %v1127_v49  ;;  %v1145_v43 = vperm.slane %v1091_v8, 2  ;;  %v1316_v2 = vunpack.c.h.bf16 %v2841_v37  ;;  %v3306_v8 = vld [vmem:[#allocation31_spill] sm:$0xff] }
 0x27d   :  { %v838_v36 = vmul.f32 %v834_v48, %v831_v22  ;;  %v839_v24 = vmul.f32 %v835_v29, %v832_v63  ;;  %v1350_v48 = vunpack.c.h.bf16 %v2834_v0  ;;  %v1139_v29 = vmul.f32 %v1131_v14, %v1126_v20 }
 0x27e   :  { %v1250_v0 = vunpack.c.h.bf16 %v2849_v50  ;;  %v1282_v14 = vunpack.c.h.bf16 %v2851_v51  ;;  %v1248_v37 = vunpack.c.h.bf16 %v2861_v3  ;;  %v3050_v52 = vadd.f32 %v1143_v26, %v1138_v54  ;;  %v3308_v54 = vld [vmem:[#allocation33_spill] sm:$0xff] }
 0x27f   :  { %v845_v56 = vadd.f32 %v841_v15, %v838_v36  ;;  %v846_v12 = vadd.f32 %v842_v13, %v839_v24  ;;  %v1252_v24 = vunpack.c.h.bf16 %v2837_v40  ;;  %v1314_v40 = vunpack.c.h.bf16 %v2853_v55 }
 0x280   :  { %v3052_v49 = vadd.f32 %v1144_v18, %v1139_v29  ;;  %v1312_v50 = vunpack.c.h.bf16 %v2865_v10  ;;  %v1344_v51 = vunpack.c.h.bf16 %v2870_v19  ;;  %v3056_v20 = vadd.f32 %v1145_v43, %v1140_v61  ;;  %v3314_v29 = vld [vmem:[#allocation39_spill] sm:$0xff]  ;;  %v3316_v61 = vld [vmem:[#allocation20_spill] sm:$0xff] }
 0x281   :  { %v847_v32 = vmax.f32 %v845_v56, 0.0  ;;  %v848_v35 = vmax.f32 %v846_v12, 0.0  ;;  %v1141_v56 = vmul.f32 %v1133_v16, %v1128_v23  ;;  %v1155_v62 = vmax.f32 %v3050_v52, 0.0  ;;  %v3310_v23 = vld [vmem:[#allocation35_spill] sm:$0xff] }
 0x282   :  { %v1156_v3 = vmax.f32 %v3052_v49, 0.0  ;;  %v1278_v10 = vunpack.c.h.bf16 %v2875_v21  ;;  %v1157_v19 = vmax.f32 %v3056_v20, 0.0  ;;  %v1310_v22 = vunpack.c.h.bf16 %v2877_v47 }
 0x283   :  { %967 = vmatmul.f32.vlgmr.msra.gmra.mxu0 %v847_v32  ;;  %987 = vmatmul.f32.vlgmr.msra.gmra.mxu1 %v848_v35  ;;  %v3058_v55 = vadd.f32 %v1146_v11, %v1141_v56  ;;  %v1342_v63 = vunpack.c.h.bf16 %v2882_v59  ;;  %v1276_v21 = vunpack.c.h.bf16 %v2889_v31  ;;  %v1308_v47 = vunpack.c.h.bf16 %v2891_v34  ;;  %v3318_v56 = vld [vmem:[#allocation22_spill] sm:$0xff] }
 0x284   :  { %1007 = vmatmul.f32.vlgmr.msra.gmra.mxu2 %v847_v32  ;;  %1027 = vmatmul.f32.vlgmr.msra.gmra.mxu3 %v848_v35  ;;  %v1340_v59 = vunpack.c.h.bf16 %v2896_v44  ;;  %v1242_v15 = vunpack.c.h.bf16 %v2899_v6  ;;  %v1274_v13 = vunpack.c.h.bf16 %v2901_v7  ;;  %v1306_v30 = vunpack.c.h.bf16 %v2903_v17  ;;  %v3303_v7 = vld [vmem:[#allocation28_spill] sm:$0xff] }
 0x285   :  { %1437 = vmatpush.msra.mxu0 %v1254_v45  ;;  %1457 = vmatpush.msra.mxu1 %v1286_v53  ;;  %v1158_v27 = vmax.f32 %v3058_v55, 0.0  ;;  %v1338_v31 = vunpack.c.h.bf16 %v2908_v41  ;;  %v1240_v57 = vunpack.c.h.bf16 %v2913_v38  ;;  %v1272_v34 = vunpack.c.h.bf16 %v2915_v33  ;;  %v3305_v41 = vld [vmem:[#allocation30_spill] sm:$0xff]  ;;  %v3307_v33 = vld [vmem:[#allocation32_spill] sm:$0xff]  ;;  %v3312_v45 = vld [vmem:[#allocation37_spill] sm:$0xff] }
 0x286   :  { %1477 = vmatpush.msra.mxu2 %v1318_v42  ;;  %1497 = vmatpush.msra.mxu3 %v1350_v48  ;;  %v1304_v44 = vunpack.c.h.bf16 %v2917_v39  ;;  %v1336_v6 = vunpack.c.h.bf16 %v2922_v58  ;;  %v1238_v4 = vunpack.c.h.bf16 %v3303_v7  ;;  %v1270_v17 = vunpack.c.h.bf16 %v3304_v5  ;;  %v3309_v58 = vld [vmem:[#allocation34_spill] sm:$0xff]  ;;  %v3311_v32 = vld [vmem:[#allocation36_spill] sm:$0xff]  ;;  %v3332_v5 = vld [vmem:[#allocation53_spill] sm:$0xff] }
 0x287   :  { %1438 = vmatpush.msra.mxu0 %v1252_v24  ;;  %1458 = vmatpush.msra.mxu1 %v1284_v25  ;;  %v1302_v36 = vunpack.c.h.bf16 %v3305_v41  ;;  %v1334_v38 = vunpack.c.h.bf16 %v3306_v8  ;;  %v1236_v12 = vunpack.c.h.bf16 %v3307_v33  ;;  %v1268_v39 = vunpack.c.h.bf16 %v3308_v54  ;;  %v3313_v42 = vld [vmem:[#allocation38_spill] sm:$0xff]  ;;  %v3315_v24 = vld [vmem:[#allocation40_spill] sm:$0xff]  ;;  %v3334_v8 = vld [vmem:[#allocation55_spill] sm:$0xff] }
 0x288   :  { %1478 = vmatpush.msra.mxu2 %v1316_v2  ;;  %1498 = vmatpush.msra.mxu3 %v1348_v60  ;;  %v1300_v26 = vunpack.c.h.bf16 %v3309_v58  ;;  %v1332_v16 = vunpack.c.h.bf16 %v3310_v23  ;;  %v1234_v35 = vunpack.c.h.bf16 %v3311_v32  ;;  %v1266_v53 = vunpack.c.h.bf16 %v3312_v45  ;;  %v3317_v2 = vld [vmem:[#allocation21_spill] sm:$0xff]  ;;  %v3331_v7 = vld [vmem:[#allocation52_spill] sm:$0xff]  ;;  %v3333_v41 = vld [vmem:[#allocation54_spill] sm:$0xff] }
 0x289   :  { %1439 = vmatpush.msra.mxu0 %v1250_v0  ;;  %1459 = vmatpush.msra.mxu1 %v1282_v14  ;;  %v1298_v48 = vunpack.c.h.bf16 %v3313_v42  ;;  %v1330_v18 = vunpack.c.h.bf16 %v3314_v29  ;;  %v1232_v25 = vunpack.c.h.bf16 %v3315_v24  ;;  %v1264_v43 = vunpack.c.h.bf16 %v3316_v61  ;;  %v3319_v0 = vld [vmem:[#allocation23_spill] sm:$0xff]  ;;  %v1351_v58 = vld [vmem:[#allocation13 + $0x24] sm:$0x3]  ;;  %v945_v55 = vld [vmem:[#allocation13 + $0x12] sm:$0x3] }
 0x28a   :  { %1479 = vmatpush.msra.mxu2 %v1314_v40  ;;  %1499 = vmatpush.msra.mxu3 %v1346_v1  ;;  %v1296_v60 = vunpack.c.h.bf16 %v3317_v2  ;;  %v1328_v11 = vunpack.c.h.bf16 %v3318_v56  ;;  %v1230_v14 = vunpack.c.h.bf16 %v3319_v0  ;;  %v3320_v40 = vld [vmem:[#allocation41_spill] sm:$0xff]  ;;  %v1353_v23 = vperm.slane %v1351_v58, 0 }
 0x28b   :  { %1440 = vmatpush.msra.mxu0 %v1248_v37  ;;  %1460 = vmatpush.msra.mxu1 %v1280_v46  ;;  %v1262_v1 = vunpack.c.h.bf16 %v3320_v40  ;;  %v3321_v37 = vld [vmem:[#allocation42_spill] sm:$0xff]  ;;  %v1354_v52 = vperm.slane %v1351_v58, 1  ;;  %v948_v42 = vperm.slane %v945_v55, 1  ;;  %v947_v24 = vperm.slane %v945_v55, 0 }
 0x28c   :  { %1480 = vmatpush.msra.mxu2 %v1312_v50  ;;  %1500 = vmatpush.msra.mxu3 %v1344_v51  ;;  %v1294_v46 = vunpack.c.h.bf16 %v3321_v37  ;;  %v3322_v50 = vld [vmem:[#allocation43_spill] sm:$0xff]  ;;  %v1593_v37 = vld [vmem:[#allocation10 + $0xf8] sm:$0xff] }
 0x28d   :  { %1373 = vmatmul.f32.vlgmr.msrb.gmra.mxu0 %v1155_v62  ;;  %1393 = vmatmul.f32.vlgmr.msrb.gmra.mxu1 %v1156_v3  ;;  %v1326_v51 = vunpack.c.h.bf16 %v3322_v50  ;;  %v1656_v50 = vunpack.c.l.bf16 %v1593_v37 }
 0x28e   :  { %1413 = vmatmul.f32.vlgmr.msrb.gmra.mxu2 %v1157_v19  ;;  %1433 = vmatmul.f32.vlgmr.msrb.gmra.mxu3 %v1158_v27 }
 0x28f   :  { %1441 = vmatpush.msra.mxu0 %v1246_v9  ;;  %1461 = vmatpush.msra.mxu1 %v1278_v10  ;;  %v3323_v9 = vld [vmem:[#allocation44_spill] sm:$0xff] }
 0x290   :  { %1481 = vmatpush.msra.mxu2 %v1310_v22  ;;  %1501 = vmatpush.msra.mxu3 %v1342_v63  ;;  %v1228_v10 = vunpack.c.h.bf16 %v3323_v9  ;;  %v3324_v22 = vld [vmem:[#allocation45_spill] sm:$0xff]  ;;  %v1657_v9 = vunpack.c.h.bf16 %v1593_v37  ;;  %v1583_v37 = vld [vmem:[#allocation10 + $0xa8] sm:$0xff] }
 0x291   :  { %1442 = vmatpush.msra.mxu0 %v1244_v28  ;;  %1462 = vmatpush.msra.mxu1 %v1276_v21  ;;  %v1260_v63 = vunpack.c.h.bf16 %v3324_v22  ;;  %v3325_v28 = vld [vmem:[#allocation46_spill] sm:$0xff]  ;;  %v1592_v22 = vld [vmem:[#allocation10 + $0xf0] sm:$0xff] }
 0x292   :  { %1482 = vmatpush.msra.mxu2 %v1308_v47  ;;  %1502 = vmatpush.msra.mxu3 %v1340_v59  ;;  %v1292_v21 = vunpack.c.h.bf16 %v3325_v28  ;;  %v3326_v47 = vld [vmem:[#allocation47_spill] sm:$0xff]  ;;  %v1654_v28 = vunpack.c.l.bf16 %v1592_v22 }
 0x293   :  { %1443 = vmatpush.msra.mxu0 %v1242_v15  ;;  %1463 = vmatpush.msra.mxu1 %v1274_v13  ;;  %v1324_v59 = vunpack.c.h.bf16 %v3326_v47  ;;  %v3327_v15 = vld [vmem:[#allocation48_spill] sm:$0xff]  ;;  %v1655_v47 = vunpack.c.h.bf16 %v1592_v22  ;;  %v1582_v22 = vld [vmem:[#allocation10 + $0xa0] sm:$0xff] }
 0x294   :  { %1483 = vmatpush.msra.mxu2 %v1306_v30  ;;  %1503 = vmatpush.msra.mxu3 %v1338_v31  ;;  %v1226_v13 = vunpack.c.h.bf16 %v3327_v15  ;;  %v3328_v30 = vld [vmem:[#allocation49_spill] sm:$0xff]  ;;  %v1591_v15 = vld [vmem:[#allocation10 + $0xe8] sm:$0xff] }
 0x295   :  { %1444 = vmatpush.msra.mxu0 %v1240_v57  ;;  %1464 = vmatpush.msra.mxu1 %v1272_v34  ;;  %v1258_v31 = vunpack.c.h.bf16 %v3328_v30  ;;  %v3329_v57 = vld [vmem:[#allocation50_spill] sm:$0xff]  ;;  %v1652_v30 = vunpack.c.l.bf16 %v1591_v15 }
 0x296   :  { %1484 = vmatpush.msra.mxu2 %v1304_v44  ;;  %1504 = vmatpush.msra.mxu3 %v1336_v6  ;;  %v1290_v34 = vunpack.c.h.bf16 %v3329_v57  ;;  %v3330_v44 = vld [vmem:[#allocation51_spill] sm:$0xff]  ;;  %v1653_v57 = vunpack.c.h.bf16 %v1591_v15  ;;  %v1581_v15 = vld [vmem:[#allocation10 + $0x98] sm:$0xff] }
 0x297   :  { %1445 = vmatpush.msra.mxu0 %v1238_v4  ;;  %1465 = vmatpush.msra.mxu1 %v1270_v17  ;;  %v1322_v6 = vunpack.c.h.bf16 %v3330_v44  ;;  %v1224_v4 = vunpack.c.h.bf16 %v3331_v7  ;;  %v1256_v17 = vunpack.c.h.bf16 %v3332_v5  ;;  %v1590_v44 = vld [vmem:[#allocation10 + $0xe0] sm:$0xff] }
 0x298   :  { %1485 = vmatpush.msra.mxu2 %v1302_v36  ;;  %1505 = vmatpush.msra.mxu3 %v1334_v38  ;;  %v1288_v36 = vunpack.c.h.bf16 %v3333_v41  ;;  %v1320_v38 = vunpack.c.h.bf16 %v3334_v8  ;;  %v1650_v7 = vunpack.c.l.bf16 %v1590_v44  ;;  %v1651_v5 = vunpack.c.h.bf16 %v1590_v44  ;;  %v1589_v41 = vld [vmem:[#allocation10 + $0xd8] sm:$0xff]  ;;  %v1580_v44 = vld [vmem:[#allocation10 + $0x90] sm:$0xff] }
 0x299   :  { %1446 = vmatpush.msra.mxu0 %v1236_v12  ;;  %1466 = vmatpush.msra.mxu1 %v1268_v39  ;;  %v1648_v8 = vunpack.c.l.bf16 %v1589_v41 }
 0x29a   :  { %1486 = vmatpush.msra.mxu2 %v1300_v26  ;;  %1506 = vmatpush.msra.mxu3 %v1332_v16 }
 0x29b   :  { %1447 = vmatpush.msra.mxu0 %v1234_v35  ;;  %1467 = vmatpush.msra.mxu1 %v1266_v53 }
 0x29c   :  { %1487 = vmatpush.msra.mxu2 %v1298_v48  ;;  %1507 = vmatpush.msra.mxu3 %v1330_v18 }
 0x29d   :  { %1448 = vmatpush.msra.mxu0 %v1232_v25  ;;  %1468 = vmatpush.msra.mxu1 %v1264_v43 }
 0x29e   :  { %1488 = vmatpush.msra.mxu2 %v1296_v60  ;;  %1508 = vmatpush.msra.mxu3 %v1328_v11 }
 0x29f   :  { %1449 = vmatpush.msra.mxu0 %v1230_v14  ;;  %1469 = vmatpush.msra.mxu1 %v1262_v1  ;;  %v1577_v1 = vld [vmem:[#allocation10 + $0x78] sm:$0xff] }
 0x2a0   :  { %1489 = vmatpush.msra.mxu2 %v1294_v46  ;;  %1509 = vmatpush.msra.mxu3 %v1326_v51  ;;  %v1624_v46 = vunpack.c.l.bf16 %v1577_v1  ;;  %v1625_v51 = vunpack.c.h.bf16 %v1577_v1  ;;  %v1567_v1 = vld [vmem:[#allocation10 + $0x28] sm:$0xff] }
 0x2a1   :  { %1450 = vmatpush.msra.mxu0 %v1228_v10  ;;  %1470 = vmatpush.msra.mxu1 %v1260_v63  ;;  %v1576_v10 = vld [vmem:[#allocation10 + $0x70] sm:$0xff] }
 0x2a2   :  { %1490 = vmatpush.msra.mxu2 %v1292_v21  ;;  %1510 = vmatpush.msra.mxu3 %v1324_v59  ;;  %v1622_v63 = vunpack.c.l.bf16 %v1576_v10  ;;  %v1623_v21 = vunpack.c.h.bf16 %v1576_v10  ;;  %v1575_v59 = vld [vmem:[#allocation10 + $0x68] sm:$0xff]  ;;  %v1566_v10 = vld [vmem:[#allocation10 + $0x20] sm:$0xff] }
 0x2a3   :  { %1451 = vmatpush.msra.mxu0 %v1226_v13  ;;  %1471 = vmatpush.msra.mxu1 %v1258_v31  ;;  %v1620_v13 = vunpack.c.l.bf16 %v1575_v59  ;;  %v1621_v31 = vunpack.c.h.bf16 %v1575_v59  ;;  %v1565_v59 = vld [vmem:[#allocation10 + $0x18] sm:$0xff] }
 0x2a4   :  { %1491 = vmatpush.msra.mxu2 %v1290_v34  ;;  %1511 = vmatpush.msra.mxu3 %v1322_v6  ;;  %v1574_v34 = vld [vmem:[#allocation10 + $0x60] sm:$0xff] }
 0x2a5   :  { %1452 = vmatpush.msra.mxu0 %v1224_v4  ;;  %1472 = vmatpush.msra.mxu1 %v1256_v17  ;;  %v1618_v6 = vunpack.c.l.bf16 %v1574_v34  ;;  %v1619_v4 = vunpack.c.h.bf16 %v1574_v34  ;;  %v1573_v17 = vld [vmem:[#allocation10 + $0x58] sm:$0xff]  ;;  %v1564_v34 = vld [vmem:[#allocation10 + $0x10] sm:$0xff] }
 0x2a6   :  { %1492 = vmatpush.msra.mxu2 %v1288_v36  ;;  %1512 = vmatpush.msra.mxu3 %v1320_v38  ;;  %v1616_v36 = vunpack.c.l.bf16 %v1573_v17  ;;  %v1617_v38 = vunpack.c.h.bf16 %v1573_v17  ;;  %v1631_v17 = vunpack.c.h.bf16 %v1580_v44 }
 0x2a7   :  { %1453 = vmatmul.f32.vlgmr.msra.gmra.mxu0 %v1155_v62  ;;  %1473 = vmatmul.f32.vlgmr.msra.gmra.mxu1 %v1156_v3 }
 0x2a8   :  { %1493 = vmatmul.f32.vlgmr.msra.gmra.mxu2 %v1157_v19  ;;  %1513 = vmatmul.f32.vlgmr.msra.gmra.mxu3 %v1158_v27 }
 0x2a9   :  { %1664 = vmatpush.msrb.mxu0 %v1624_v46  ;;  %1684 = vmatpush.msrb.mxu1 %v1656_v50  ;;  %v1604_v46 = vunpack.c.l.bf16 %v1567_v1  ;;  %v1636_v50 = vunpack.c.l.bf16 %v1583_v37 }
 0x2aa   :  { %1704 = vmatpush.msrb.mxu2 %v1625_v51  ;;  %1724 = vmatpush.msrb.mxu3 %v1657_v9  ;;  %v1605_v51 = vunpack.c.h.bf16 %v1567_v1  ;;  %v1637_v9 = vunpack.c.h.bf16 %v1583_v37 }
 0x2ab   :  { %1665 = vmatpush.msrb.mxu0 %v1622_v63  ;;  %1685 = vmatpush.msrb.mxu1 %v1654_v28  ;;  %v1602_v63 = vunpack.c.l.bf16 %v1566_v10  ;;  %v1634_v28 = vunpack.c.l.bf16 %v1582_v22 }
 0x2ac   :  { %1705 = vmatpush.msrb.mxu2 %v1623_v21  ;;  %1725 = vmatpush.msrb.mxu3 %v1655_v47  ;;  %v1603_v21 = vunpack.c.h.bf16 %v1566_v10  ;;  %v1635_v47 = vunpack.c.h.bf16 %v1582_v22 }
 0x2ad   :  { %1666 = vmatpush.msrb.mxu0 %v1620_v13  ;;  %1686 = vmatpush.msrb.mxu1 %v1652_v30  ;;  %v1600_v13 = vunpack.c.l.bf16 %v1565_v59  ;;  %v1632_v30 = vunpack.c.l.bf16 %v1581_v15 }
 0x2ae   :  { %1706 = vmatpush.msrb.mxu2 %v1621_v31  ;;  %1726 = vmatpush.msrb.mxu3 %v1653_v57  ;;  %v1601_v31 = vunpack.c.h.bf16 %v1565_v59  ;;  %v1633_v57 = vunpack.c.h.bf16 %v1581_v15 }
 0x2af   :  { %1667 = vmatpush.msrb.mxu0 %v1618_v6  ;;  %1687 = vmatpush.msrb.mxu1 %v1650_v7  ;;  %v1563_v6 = vld [vmem:[#allocation10 + $0x8] sm:$0xff]  ;;  %v1598_v7 = vunpack.c.l.bf16 %v1564_v34 }
 0x2b0   :  { %1707 = vmatpush.msrb.mxu2 %v1619_v4  ;;  %1727 = vmatpush.msrb.mxu3 %v1651_v5  ;;  %v1630_v4 = vunpack.c.l.bf16 %v1580_v44  ;;  %v1599_v5 = vunpack.c.h.bf16 %v1564_v34 }
 0x2b1   :  { %1668 = vmatpush.msrb.mxu0 %v1616_v36  ;;  %1688 = vmatpush.msrb.mxu1 %v1648_v8  ;;  %v1562_v36 = vld [vmem:[#allocation10] sm:$0xff] }
 0x2b2   :  { %1708 = vmatpush.msrb.mxu2 %v1617_v38  ;;  %v1578_v8 = vld [vmem:[#allocation10 + $0x80] sm:$0xff]  ;;  %v1596_v38 = vunpack.c.l.bf16 %v1563_v6 }
 0x300   :  { %v968_v33 = vpop.f32.mrf.mxu0  ;;  %v988_v12 = vpop.f32.mrf.mxu1 }
 0x301   :  { %v969_v56 = vadd.f32 %v968_v33, %v947_v24  ;;  %v1649_v33 = vunpack.c.h.bf16 %v1589_v41  ;;  %v1579_v41 = vld [vmem:[#allocation10 + $0x88] sm:$0xff] }
 0x303   :  { %v3140_v14 = vadd.f32 %v988_v12, %v969_v56  ;;  %v1572_v12 = vld [vmem:[#allocation10 + $0x50] sm:$0xff]  ;;  %1728 = vmatpush.msrb.mxu3 %v1649_v33  ;;  %v1628_v33 = vunpack.c.l.bf16 %v1579_v41 }
 0x307   :  { %v1008_v54 = vpop.f32.mrf.mxu2  ;;  %v1028_v39 = vpop.f32.mrf.mxu3 }
 0x308   :  { %v1009_v61 = vadd.f32 %v1008_v54, %v948_v42  ;;  %v1588_v54 = vld [vmem:[#allocation10 + $0xd0] sm:$0xff]  ;;  %v1585_v42 = vld [vmem:[#allocation10 + $0xb8] sm:$0xff] }
 0x309   :  { %v1646_v58 = vunpack.c.l.bf16 %v1588_v54 }
 0x30a   :  { %v1374_v26 = vpop.f32.mrf.mxu0  ;;  %v1394_v16 = vpop.f32.mrf.mxu1  ;;  %v3138_v0 = vadd.f32 %v1028_v39, %v1009_v61  ;;  %v1614_v39 = vunpack.c.l.bf16 %v1572_v12  ;;  %v1641_v61 = vunpack.c.h.bf16 %v1585_v42 }
 0x30b   :  { %v1375_v32 = vadd.f32 %v1374_v26, %v1353_v23  ;;  %v1615_v26 = vunpack.c.h.bf16 %v1572_v12  ;;  %v1647_v23 = vunpack.c.h.bf16 %v1588_v54  ;;  %1689 = vmatpush.msrb.mxu1 %v1646_v58  ;;  %v1597_v12 = vunpack.c.h.bf16 %v1563_v6 }
 0x30c   :  { %v1033_v40 = vadd.f32 %v3138_v0, %v3140_v14  ;;  %1669 = vmatpush.msrb.mxu0 %v1614_v39  ;;  %v1629_v54 = vunpack.c.h.bf16 %v1579_v41  ;;  %v1594_v39 = vunpack.c.l.bf16 %v1562_v36  ;;  %v1626_v58 = vunpack.c.l.bf16 %v1578_v8 }
 0x30d   :  { %v1395_v3 = vadd.f32 %v1394_v16, %v1375_v32  ;;  %v1571_v16 = vld [vmem:[#allocation10 + $0x48] sm:$0xff]  ;;  %1709 = vmatpush.msrb.mxu2 %v1615_v26  ;;  %1729 = vmatpush.msrb.mxu3 %v1647_v23  ;;  %v1595_v26 = vunpack.c.h.bf16 %v1562_v36  ;;  %v1627_v23 = vunpack.c.h.bf16 %v1578_v8  ;;  %v1037_v44 = vmul.f32 %v3138_v0, %v3138_v0 }
 0x30e   :  { %v1587_v32 = vld [vmem:[#allocation10 + $0xc8] sm:$0xff]  ;;  %v1036_v6 = vmul.f32 %v3140_v14, %v3140_v14 }
 0x311   :  { %v1414_v62 = vpop.f32.mrf.mxu2  ;;  %v1434_v49 = vpop.f32.mrf.mxu3 }
 0x312   :  { %v1415_v20 = vadd.f32 %v1414_v62, %v1395_v3  ;;  %v1644_v62 = vunpack.c.l.bf16 %v1587_v32  ;;  %v1570_v3 = vld [vmem:[#allocation10 + $0x40] sm:$0xff] }
 0x314   :  { %v3128_v48 = vadd.f32 %v1434_v49, %v1415_v20  ;;  %v1645_v49 = vunpack.c.h.bf16 %v1587_v32  ;;  %1690 = vmatpush.msrb.mxu1 %v1644_v62  ;;  %v1610_v20 = vunpack.c.l.bf16 %v1570_v3 }
 0x316   :  { %v1522_v2 = vmul.f32 %v3128_v48, %v3128_v48  ;;  %1730 = vmatpush.msrb.mxu3 %v1645_v49 }
 0x324   :  { %v1454_v35 = vpop.f32.mrf.mxu0  ;;  %v1474_v19 = vpop.f32.mrf.mxu1 }
 0x325   :  { %v1455_v45 = vadd.f32 %v1454_v35, %v1354_v52  ;;  %v1612_v52 = vunpack.c.l.bf16 %v1571_v16  ;;  %v1613_v35 = vunpack.c.h.bf16 %v1571_v16 }
 0x327   :  { %v1475_v53 = vadd.f32 %v1474_v19, %v1455_v45  ;;  %v1586_v45 = vld [vmem:[#allocation10 + $0xc0] sm:$0xff]  ;;  %1670 = vmatpush.msrb.mxu0 %v1612_v52  ;;  %1710 = vmatpush.msrb.mxu2 %v1613_v35 }
 0x328   :  { %v1642_v19 = vunpack.c.l.bf16 %v1586_v45  ;;  %v1643_v55 = vunpack.c.h.bf16 %v1586_v45 }
 0x329   :  { %1671 = vmatpush.msrb.mxu0 %v1610_v20 }
 0x32a   :  { %1691 = vmatpush.msrb.mxu1 %v1642_v19  ;;  %1731 = vmatpush.msrb.mxu3 %v1643_v55 }
 0x32b   :  { %v1494_v27 = vpop.f32.mrf.mxu2  ;;  %v1514_v18 = vpop.f32.mrf.mxu3 }
 0x32c   :  { %v1495_v29 = vadd.f32 %v1494_v27, %v1475_v53  ;;  %v1611_v53 = vunpack.c.h.bf16 %v1570_v3  ;;  %v1569_v27 = vld [vmem:[#allocation10 + $0x38] sm:$0xff]  ;;  %1732 = vmatpush.msrb.mxu3 %v1641_v61 }
 0x32d   :  { %v1609_v24 = vunpack.c.h.bf16 %v1569_v27 }
 0x32e   :  { %v3130_v25 = vadd.f32 %v1514_v18, %v1495_v29  ;;  %v1608_v29 = vunpack.c.l.bf16 %v1569_v27  ;;  %v1640_v18 = vunpack.c.l.bf16 %v1585_v42  ;;  %1711 = vmatpush.msrb.mxu2 %v1611_v53  ;;  %v1517_v27 = vld [vmem:[#allocation13 + $0x26] sm:$0x3] }
 0x32f   :  { %v1547_v61 = vperm.slane %v1517_v27, 0 }
 0x330   :  { %v1519_v43 = vadd.f32 %v3130_v25, %v3128_v48  ;;  %v1523_v60 = vmul.f32 %v3130_v25, %v3130_v25  ;;  %1672 = vmatpush.msrb.mxu0 %v1608_v29  ;;  %1692 = vmatpush.msrb.mxu1 %v1640_v18  ;;  %v1518_v29 = vld [vmem:[#allocation13 + $0x28] sm:$0x3] }
 0x331   :  { %1712 = vmatpush.msrb.mxu2 %v1609_v24 }
 0x332   :  { %1520 = vadd.xlane.f32.xlu0 %v1519_v43  ;;  %v1524_v11 = vadd.f32 %v1523_v60, %v1522_v2  ;;  %v1568_v43 = vld [vmem:[#allocation10 + $0x30] sm:$0xff] }
 0x333   :  { %v1584_v2 = vld [vmem:[#allocation10 + $0xb0] sm:$0xff]  ;;  %v1606_v60 = vunpack.c.l.bf16 %v1568_v43 }
 0x334   :  { %1525 = vadd.xlane.f32.xlu1 %v1524_v11  ;;  %v1638_v56 = vunpack.c.l.bf16 %v1584_v2  ;;  %v1607_v11 = vunpack.c.h.bf16 %v1568_v43  ;;  %v1548_v43 = vperm.slane %v1517_v27, 1 }
 0x335   :  { %1673 = vmatpush.msrb.mxu0 %v1606_v60 }
 0x336   :  { %1693 = vmatpush.msrb.mxu1 %v1638_v56  ;;  %1713 = vmatpush.msrb.mxu2 %v1607_v11  ;;  %v1554_v11 = vperm.slane %v1518_v29, 0 }
 0x337   :  { %1674 = vmatpush.msrb.mxu0 %v1604_v46 }
 0x338   :  { %1694 = vmatpush.msrb.mxu1 %v1636_v50  ;;  %1714 = vmatpush.msrb.mxu2 %v1605_v51 }
 0x339   :  { %1675 = vmatpush.msrb.mxu0 %v1602_v63 }
 0x33a   :  { %1034 = vadd.xlane.f32.xlu0 %v1033_v40  ;;  %v1639_v40 = vunpack.c.h.bf16 %v1584_v2  ;;  %1695 = vmatpush.msrb.mxu1 %v1634_v28 }
 0x33b   :  { %1715 = vmatpush.msrb.mxu2 %v1603_v21  ;;  %1676 = vmatpush.msrb.mxu0 %v1600_v13 }
 0x33c   :  { %1733 = vmatpush.msrb.mxu3 %v1639_v40  ;;  %1696 = vmatpush.msrb.mxu1 %v1632_v30  ;;  %v1555_v40 = vperm.slane %v1518_v29, 1  ;;  %v2166_v29 = vld [vmem:[#allocation12 + $0xa0] sm:$0xff]  }
 0x33d   :  { %1716 = vmatpush.msrb.mxu2 %v1601_v31  ;;  %1677 = vmatpush.msrb.mxu0 %v1598_v7  ;;  %v1038_v7 = vadd.f32 %v1037_v44, %v1036_v6  ;;  %v2149_v6 = vld [vmem:[#allocation12 + $0x18] sm:$0xff]  }
 0x33e   :  { %1734 = vmatpush.msrb.mxu3 %v1637_v9  ;;  %1697 = vmatpush.msrb.mxu1 %v1630_v4  ;;  %v2169_v4 = vld [vmem:[#allocation12 + $0xb8] sm:$0xff]  }
 0x33f   :  { %1717 = vmatpush.msrb.mxu2 %v1599_v5  ;;  %1678 = vmatpush.msrb.mxu0 %v1596_v38  ;;  %v2177_v5 = vld [vmem:[#allocation12 + $0xf8] sm:$0xff]   ;;  %v2113_v36 = vunpack.c.l.bf16 %v2169_v4  ;;  %v2168_v38 = vld [vmem:[#allocation12 + $0xb0] sm:$0xff]  }
 0x340   :  { %1735 = vmatpush.msrb.mxu3 %v1635_v47  ;;  %1698 = vmatpush.msrb.mxu1 %v1628_v33  ;;  %v2146_v41 = vunpack.c.h.bf16 %v2177_v5  ;;  %v2145_v8 = vunpack.c.l.bf16 %v2177_v5  ;;  %v2176_v33 = vld [vmem:[#allocation12 + $0xf0] sm:$0xff]  }
 0x341   :  { %1718 = vmatpush.msrb.mxu2 %v1597_v12  ;;  %1679 = vmatpush.msrb.mxu0 %v1594_v39  ;;  %v2110_v12 = vunpack.c.h.bf16 %v2168_v38  ;;  %v2153_v39 = vld [vmem:[#allocation12 + $0x38] sm:$0xff]  }
 0x342   :  { %1736 = vmatpush.msrb.mxu3 %v1633_v57  ;;  %1699 = vmatpush.msrb.mxu1 %v1626_v58  ;;  %v2161_v58 = vld [vmem:[#allocation12 + $0x78] sm:$0xff]  }
 0x343   :  { %1719 = vmatpush.msrb.mxu2 %v1595_v26  ;;  %v2050_v26 = vunpack.c.h.bf16 %v2153_v39 }
 0x344   :  { %1737 = vmatpush.msrb.mxu3 %v1631_v17  ;;  %v2114_v17 = vunpack.c.h.bf16 %v2169_v4  ;;  %v2034_v4 = vunpack.c.h.bf16 %v2149_v6 }
 0x345   :  { %1921 = vmatpush.msra.mxu0 %v2050_v26 }
 0x346   :  { %1738 = vmatpush.msrb.mxu3 %v1629_v54  ;;  %1961 = vmatpush.msra.mxu2 %v2114_v17  ;;  %v2142_v54 = vunpack.c.h.bf16 %v2176_v33 }
 0x348   :  { %1739 = vmatpush.msrb.mxu3 %v1627_v23  ;;  %1962 = vmatpush.msra.mxu2 %v2113_v36  ;;  %v2082_v23 = vunpack.c.h.bf16 %v2161_v58  ;;  %v2163_v36 = vld [vmem:[#allocation12 + $0x88] sm:$0xff]  }
 0x34a   :  { %1981 = vmatpush.msra.mxu3 %v2146_v41  ;;  %1963 = vmatpush.msra.mxu2 %v2110_v12  ;;  %v2090_v12 = vunpack.c.h.bf16 %v2163_v36 }
 0x34b   :  { %1941 = vmatpush.msra.mxu1 %v2082_v23 }
 0x34c   :  { %1982 = vmatpush.msra.mxu3 %v2145_v8  ;;  %v2171_v8 = vld [vmem:[#allocation12 + $0xc8] sm:$0xff]  }
 0x34e   :  { %1983 = vmatpush.msra.mxu3 %v2142_v54  ;;  %v2122_v54 = vunpack.c.h.bf16 %v2171_v8 }
 0x3a5   :  { %v1521_v16 = vpop.xlane.xlu0 %1520 }
 0x3a6   :  { %v1527_v32 = vmul.f32 0.00390625, %v1521_v16  ;;  %v2109_v16 = vunpack.c.l.bf16 %v2168_v38  ;;  %v2033_v38 = vunpack.c.l.bf16 %v2149_v6 }
 0x3a7   :  { %v1526_v52 = vpop.xlane.xlu1 %1525 }
 0x3a8   :  { %v1528_v62 = vmul.f32 0.00390625, %v1526_v52  ;;  %v1529_v35 = vmul.f32 %v1527_v32, %v1527_v32  ;;  %v1542_v18 = vsub.f32 %v3128_v48, %v1527_v32  ;;  %v1543_v24 = vsub.f32 %v3130_v25, %v1527_v32  ;;  %v1658_v48 = vld [vmem:[#allocation13 + $0x2a] sm:$0x3]  ;;  %1964 = vmatpush.msra.mxu2 %v2109_v16 }
 0x3a9   :  { %v1660_v25 = vperm.slane %v1658_v48, 0  ;;  %v1661_v63 = vperm.slane %v1658_v48, 1  ;;  %v2141_v32 = vunpack.c.l.bf16 %v2176_v33  ;;  %v2167_v52 = vld [vmem:[#allocation12 + $0xa8] sm:$0xff]   ;;  %v2089_v16 = vunpack.c.l.bf16 %v2163_v36 }
 0x3aa   :  { %v1530_v49 = vsub.f32 %v1528_v62, %v1529_v35  ;;  %v2175_v62 = vld [vmem:[#allocation12 + $0xe8] sm:$0xff]   ;;  %v2049_v35 = vunpack.c.l.bf16 %v2153_v39  ;;  %v2105_v27 = vunpack.c.l.bf16 %v2167_v52  ;;  %v2148_v39 = vld [vmem:[#allocation12 + $0x10] sm:$0xff]  }
 0x3ab   :  { %1984 = vmatpush.msra.mxu3 %v2141_v32  ;;  %v2030_v26 = vunpack.c.h.bf16 %v2148_v39  ;;  %v2121_v32 = vunpack.c.l.bf16 %v2171_v8 }
 0x3ac   :  { %v1531_v3 = vadd.f32 1e-05, %v1530_v49  ;;  %v2081_v49 = vunpack.c.l.bf16 %v2161_v58  ;;  %1922 = vmatpush.msra.mxu0 %v2049_v35  ;;  %v2156_v58 = vld [vmem:[#allocation12 + $0x50] sm:$0xff]   ;;  %v2029_v35 = vunpack.c.l.bf16 %v2148_v39 }
 0x3ad   :  { %v2062_v23 = vunpack.c.h.bf16 %v2156_v58 }
 0x3ae   :  { %2199 = vrsqrt.f32 %v1531_v3  ;;  %vm1538_vm11 = vweird.f32 %v1531_v3  ;;  %1942 = vmatpush.msra.mxu1 %v2081_v49  ;;  %v2061_v49 = vunpack.c.l.bf16 %v2156_v58 }
 0x3b4   :  { %v2200_v45 = vpop.eup %2199 }
 0x3b5   :  { %v1533_v20 = vmul.f32 %v2200_v45, %v1531_v3  ;;  %vm1539_vm10 = vweird.f32 %v2200_v45  ;;  %v2106_v3 = vunpack.c.h.bf16 %v2167_v52  ;;  %v2162_v52 = vld [vmem:[#allocation12 + $0x80] sm:$0xff]  }
 0x3b6   :  { %vm1540_vm12 = vmor %vm1538_vm11, %vm1539_vm10 }
 0x3b7   :  { %v1534_v19 = vmul.f32 %v2200_v45, %v1533_v20  ;;  %v2152_v20 = vld [vmem:[#allocation12 + $0x30] sm:$0xff]   ;;  %1965 = vmatpush.msra.mxu2 %v2106_v3  ;;  %v2086_v3 = vunpack.c.h.bf16 %v2162_v52 }
 0x3b9   :  { %v1535_v53 = vmul.f32 0.5, %v1534_v19  ;;  %v2160_v19 = vld [vmem:[#allocation12 + $0x70] sm:$0xff]   ;;  %1966 = vmatpush.msra.mxu2 %v2105_v27 }
 0x3bb   :  { %v1536_v55 = vsub.f32 1.5, %v1535_v53  ;;  %v2046_v53 = vunpack.c.h.bf16 %v2152_v20 }
 0x3bd   :  { %v1537_v42 = vmul.f32 %v2200_v45, %v1536_v55  ;;  %v2078_v55 = vunpack.c.h.bf16 %v2160_v19  ;;  %1923 = vmatpush.msra.mxu0 %v2046_v53 }
 0x3bf   :  { %v1541_v2 = vsel %vm1540_vm12, %v2200_v45, %v1537_v42  ;;  %v2138_v45 = vunpack.c.h.bf16 %v2175_v62  ;;  %v2137_v42 = vunpack.c.l.bf16 %v2175_v62  ;;  %1943 = vmatpush.msra.mxu1 %v2078_v55  ;;  %v2170_v62 = vld [vmem:[#allocation12 + $0xc0] sm:$0xff]  }
 0x3c0   :  { %v1544_v60 = vmul.f32 %v1542_v18, %v1541_v2  ;;  %v1545_v56 = vmul.f32 %v1543_v24, %v1541_v2  ;;  %v2174_v18 = vld [vmem:[#allocation12 + $0xe0] sm:$0xff]   ;;  %v2045_v24 = vunpack.c.l.bf16 %v2152_v20  ;;  %v2147_v20 = vld [vmem:[#allocation12 + $0x8] sm:$0xff]  }
 0x3c1   :  { %1985 = vmatpush.msra.mxu3 %v2138_v45  ;;  %v2134_v2 = vunpack.c.h.bf16 %v2174_v18  ;;  %v2118_v45 = vunpack.c.h.bf16 %v2170_v62  ;;  %v2026_v55 = vunpack.c.h.bf16 %v2147_v20 }
 0x3c2   :  { %v1551_v1 = vmul.f32 %v1547_v61, %v1544_v60  ;;  %v1552_v37 = vmul.f32 %v1548_v43, %v1545_v56  ;;  %v2077_v61 = vunpack.c.l.bf16 %v2160_v19  ;;  %v2102_v43 = vunpack.c.h.bf16 %v2166_v29  ;;  %v2151_v60 = vld [vmem:[#allocation12 + $0x28] sm:$0xff]   ;;  %1924 = vmatpush.msra.mxu0 %v2045_v24  ;;  %v1035_v24 = vpop.xlane.xlu0 %1034 }
 0x3c3   :  { %1986 = vmatpush.msra.mxu3 %v2137_v42  ;;  %v2159_v56 = vld [vmem:[#allocation12 + $0x68] sm:$0xff]   ;;  %v2085_v42 = vunpack.c.l.bf16 %v2162_v52 }
 0x3c4   :  { %v1558_v46 = vadd.f32 %v1554_v11, %v1551_v1  ;;  %v1559_v50 = vadd.f32 %v1555_v40, %v1552_v37  ;;  %1944 = vmatpush.msra.mxu1 %v2077_v61  ;;  %v2042_v11 = vunpack.c.h.bf16 %v2151_v60  ;;  %v2074_v40 = vunpack.c.h.bf16 %v2159_v56  ;;  %1967 = vmatpush.msra.mxu2 %v2102_v43  ;;  %v2155_v19 = vld [vmem:[#allocation12 + $0x48] sm:$0xff]  }
 0x3c5   :  { %v2101_v1 = vunpack.c.l.bf16 %v2166_v29  ;;  %v2133_v37 = vunpack.c.l.bf16 %v2174_v18  ;;  %1987 = vmatpush.msra.mxu3 %v2134_v2  ;;  %v2058_v27 = vunpack.c.h.bf16 %v2155_v19  ;;  %v2117_v29 = vunpack.c.l.bf16 %v2170_v62 }
 0x3c6   :  { %v1560_v51 = vmax.f32 %v1558_v46, 0.0  ;;  %v1561_v9 = vmax.f32 %v1559_v50, 0.0  ;;  %v2165_v46 = vld [vmem:[#allocation12 + $0x98] sm:$0xff]   ;;  %1925 = vmatpush.msra.mxu0 %v2042_v11  ;;  %1945 = vmatpush.msra.mxu1 %v2074_v40  ;;  %v2025_v43 = vunpack.c.l.bf16 %v2147_v20  ;;  %v2057_v2 = vunpack.c.l.bf16 %v2155_v19  ;;  %v2020_v11 = vld [vmem:[#allocation12] sm:$0xff]  }
 0x3c7   :  { %v2173_v50 = vld [vmem:[#allocation12 + $0xd8] sm:$0xff]   ;;  %v2098_v48 = vunpack.c.h.bf16 %v2165_v46  ;;  %1968 = vmatpush.msra.mxu2 %v2101_v1  ;;  %1988 = vmatpush.msra.mxu3 %v2133_v37  ;;  %v2154_v40 = vld [vmem:[#allocation12 + $0x40] sm:$0xff]   ;;  %v2022_v1 = vunpack.c.h.bf16 %v2020_v11 }
 0x3c8   :  { %1680 = vmatmul.f32.vlgmr.msrb.gmra.mxu0 %v1560_v51  ;;  %1700 = vmatmul.f32.vlgmr.msrb.gmra.mxu1 %v1561_v9  ;;  %v2054_v37 = vunpack.c.h.bf16 %v2154_v40 }
 0x3c9   :  { %1720 = vmatmul.f32.vlgmr.msrb.gmra.mxu2 %v1560_v51  ;;  %1740 = vmatmul.f32.vlgmr.msrb.gmra.mxu3 %v1561_v9  ;;  %v2041_v51 = vunpack.c.l.bf16 %v2151_v60  ;;  %v2073_v9 = vunpack.c.l.bf16 %v2159_v56 }
 0x3ca   :  { %1969 = vmatpush.msra.mxu2 %v2098_v48 }
 0x3cb   :  { %1926 = vmatpush.msra.mxu0 %v2041_v51  ;;  %1946 = vmatpush.msra.mxu1 %v2073_v9  ;;  %v1041_v51 = vmul.f32 0.00390625, %v1035_v24 }
 0x3cd   :  { %v1056_v52 = vsub.f32 %v3140_v14, %v1041_v51 }
 0x445   :  { %v1681_v10 = vpop.f32.mrf.mxu0  ;;  %v1701_v28 = vpop.f32.mrf.mxu1 }
 0x446   :  { %v1682_v22 = vadd.f32 %v1681_v10, %v1660_v25  ;;  %v2130_v25 = vunpack.c.h.bf16 %v2173_v50  ;;  %v2150_v10 = vld [vmem:[#allocation12 + $0x20] sm:$0xff]  }
 0x448   :  { %v3146_v47 = vadd.f32 %v1701_v28, %v1682_v22  ;;  %v2158_v22 = vld [vmem:[#allocation12 + $0x60] sm:$0xff]   ;;  %1989 = vmatpush.msra.mxu3 %v2130_v25 }
 0x449   :  { %v2070_v28 = vunpack.c.h.bf16 %v2158_v22 }
 0x44a   :  { %v1749_v31 = vmul.f32 %v3146_v47, %v3146_v47 }
 0x44b   :  { %1947 = vmatpush.msra.mxu1 %v2070_v28 }
 0x44c   :  { %v1721_v21 = vpop.f32.mrf.mxu2  ;;  %v1741_v15 = vpop.f32.mrf.mxu3 }
 0x44d   :  { %v1722_v59 = vadd.f32 %v1721_v21, %v1661_v63  ;;  %v2038_v63 = vunpack.c.h.bf16 %v2150_v10  ;;  %v2097_v21 = vunpack.c.l.bf16 %v2165_v46  ;;  %v2021_v46 = vunpack.c.l.bf16 %v2020_v11 }
 0x44f   :  { %v3148_v13 = vadd.f32 %v1741_v15, %v1722_v59  ;;  %v2129_v59 = vunpack.c.l.bf16 %v2173_v50  ;;  %v2164_v15 = vld [vmem:[#allocation12 + $0x90] sm:$0xff]   ;;  %1927 = vmatpush.msra.mxu0 %v2038_v63  ;;  %1970 = vmatpush.msra.mxu2 %v2097_v21  ;;  %v2053_v50 = vunpack.c.l.bf16 %v2154_v40 }
 0x450   :  { %v2093_v17 = vunpack.c.l.bf16 %v2164_v15 }
 0x451   :  { %v1746_v30 = vadd.f32 %v3148_v13, %v3146_v47  ;;  %v1750_v57 = vmul.f32 %v3148_v13, %v3148_v13  ;;  %1990 = vmatpush.msra.mxu3 %v2129_v59 }
 0x453   :  { %1747 = vadd.xlane.f32.xlu2 %v1746_v30  ;;  %v1751_v34 = vadd.f32 %v1750_v57, %v1749_v31  ;;  %v2172_v30 = vld [vmem:[#allocation12 + $0xd0] sm:$0xff]   ;;  %v2037_v31 = vunpack.c.l.bf16 %v2150_v10  ;;  %v2069_v57 = vunpack.c.l.bf16 %v2158_v22  ;;  %v1043_v22 = vmul.f32 %v1041_v51, %v1041_v51 }
 0x454   :  { %v2126_v44 = vunpack.c.h.bf16 %v2172_v30  ;;  %v2125_v41 = vunpack.c.l.bf16 %v2172_v30 }
 0x455   :  { %1752 = vadd.xlane.f32.xlu1 %v1751_v34  ;;  %v2094_v34 = vunpack.c.h.bf16 %v2164_v15  ;;  %1928 = vmatpush.msra.mxu0 %v2037_v31 }
 0x456   :  { %1948 = vmatpush.msra.mxu1 %v2069_v57  ;;  %1991 = vmatpush.msra.mxu3 %v2126_v44  ;;  %v1744_v44 = vld [vmem:[#allocation13 + $0x2c] sm:$0x3] }
 0x457   :  { %1971 = vmatpush.msra.mxu2 %v2094_v34  ;;  %1929 = vmatpush.msra.mxu0 %v2034_v4  ;;  %v1745_v4 = vld [vmem:[#allocation13 + $0x2e] sm:$0x3]  ;;  %v1775_v36 = vperm.slane %v1744_v44, 1 }
 0x458   :  { %1992 = vmatpush.msra.mxu3 %v2125_v41  ;;  %v1774_v41 = vperm.slane %v1744_v44, 0  ;;  %v1782_v39 = vperm.slane %v1745_v4, 1 }
 0x459   :  { %1972 = vmatpush.msra.mxu2 %v2093_v17  ;;  %1930 = vmatpush.msra.mxu0 %v2033_v38 }
 0x45a   :  { %1993 = vmatpush.msra.mxu3 %v2122_v54  ;;  %v1781_v54 = vperm.slane %v1745_v4, 0 }
 0x45b   :  { %1039 = vadd.xlane.f32.xlu2 %v1038_v7  ;;  %v2157_v7 = vld [vmem:[#allocation12 + $0x58] sm:$0xff]   ;;  %1973 = vmatpush.msra.mxu2 %v2090_v12 }
 0x45c   :  { %v2066_v5 = vunpack.c.h.bf16 %v2157_v7  ;;  %v2065_v33 = vunpack.c.l.bf16 %v2157_v7  ;;  %1931 = vmatpush.msra.mxu0 %v2030_v26  ;;  %1994 = vmatpush.msra.mxu3 %v2121_v32  ;;  %v1031_v26 = vld [vmem:[#allocation13 + $0x14] sm:$0x3]  ;;  %v1032_v32 = vld [vmem:[#allocation13 + $0x16] sm:$0x3] }
 0x45d   :  { %1974 = vmatpush.msra.mxu2 %v2089_v16  ;;  %v1068_v20 = vperm.slane %v1032_v32, 0  ;;  %v1069_v19 = vperm.slane %v1032_v32, 1 }
 0x45e   :  { %1949 = vmatpush.msra.mxu1 %v2066_v5  ;;  %1932 = vmatpush.msra.mxu0 %v2029_v35 }
 0x45f   :  { %1975 = vmatpush.msra.mxu2 %v2086_v3  ;;  %1995 = vmatpush.msra.mxu3 %v2118_v45  ;;  %v1062_v3 = vperm.slane %v1031_v26, 1 }
 0x460   :  { %1950 = vmatpush.msra.mxu1 %v2065_v33  ;;  %1933 = vmatpush.msra.mxu0 %v2026_v55 }
 0x461   :  { %1976 = vmatpush.msra.mxu2 %v2085_v42  ;;  %1996 = vmatpush.msra.mxu3 %v2117_v29 }
 0x462   :  { %1951 = vmatpush.msra.mxu1 %v2062_v23  ;;  %1934 = vmatpush.msra.mxu0 %v2025_v43  ;;  %v2192_v43 = vld [vmem:[#allocation13 + $0x30] ss:$0 sm:$0xff] }
 0x464   :  { %1952 = vmatpush.msra.mxu1 %v2061_v49  ;;  %1935 = vmatpush.msra.mxu0 %v2022_v1  ;;  %v1061_v49 = vperm.slane %v1031_v26, 0 }
 0x466   :  { %1953 = vmatpush.msra.mxu1 %v2058_v27  ;;  %1936 = vmatpush.msra.mxu0 %v2021_v46 }
 0x468   :  { %1954 = vmatpush.msra.mxu1 %v2057_v2 }
 0x46a   :  { %1955 = vmatpush.msra.mxu1 %v2054_v37 }
 0x46c   :  { %1956 = vmatpush.msra.mxu1 %v2053_v50 }
 0x4c6   :  { %v1748_v53 = vpop.xlane.xlu2 %1747 }
 0x4c7   :  { %v1754_v18 = vmul.f32 0.00390625, %v1748_v53 }
 0x4c8   :  { %v1753_v61 = vpop.xlane.xlu1 %1752 }
 0x4c9   :  { %v1755_v60 = vmul.f32 0.00390625, %v1753_v61  ;;  %v1756_v56 = vmul.f32 %v1754_v18, %v1754_v18  ;;  %v1769_v5 = vsub.f32 %v3146_v47, %v1754_v18  ;;  %v1770_v17 = vsub.f32 %v3148_v13, %v1754_v18 }
 0x4ca   :  { %v1057_v47 = vsub.f32 %v3138_v0, %v1041_v51 }
 0x4cb   :  { %v1757_v9 = vsub.f32 %v1755_v60, %v1756_v56 }
 0x4cd   :  { %v1758_v48 = vadd.f32 1e-05, %v1757_v9 }
 0x4ce   :  { %v1040_v25 = vpop.xlane.xlu2 %1039 }
 0x4cf   :  { %2201 = vrsqrt.f32 %v1758_v48  ;;  %v1042_v10 = vmul.f32 0.00390625, %v1040_v25  ;;  %vm1765_vm14 = vweird.f32 %v1758_v48 }
 0x4d1   :  { %v1044_v63 = vsub.f32 %v1042_v10, %v1043_v22 }
 0x4d3   :  { %v1045_v28 = vadd.f32 1e-05, %v1044_v63 }
 0x4d5   :  { %v2202_v21 = vpop.eup %2201  ;;  %2203 = vrsqrt.f32 %v1045_v28  ;;  %vm1052_vm1 = vweird.f32 %v1045_v28 }
 0x4d6   :  { %v1760_v59 = vmul.f32 %v2202_v21, %v1758_v48  ;;  %vm1766_vm13 = vweird.f32 %v2202_v21 }
 0x4d7   :  { %vm1767_vm15 = vmor %vm1765_vm14, %vm1766_vm13 }
 0x4d8   :  { %v1761_v15 = vmul.f32 %v2202_v21, %v1760_v59 }
 0x4da   :  { %v1762_v30 = vmul.f32 0.5, %v1761_v15 }
 0x4db   :  { %v2204_v31 = vpop.eup %2203 }
 0x4dc   :  { %v1763_v57 = vsub.f32 1.5, %v1762_v30  ;;  %v1047_v34 = vmul.f32 %v2204_v31, %v1045_v28  ;;  %vm1053_vm0 = vweird.f32 %v2204_v31 }
 0x4dd   :  { %vm1054_vm2 = vmor %vm1052_vm1, %vm1053_vm0 }
 0x4de   :  { %v1764_v6 = vmul.f32 %v2202_v21, %v1763_v57  ;;  %v1048_v7 = vmul.f32 %v2204_v31, %v1047_v34 }
 0x4e0   :  { %v1768_v8 = vsel %vm1767_vm15, %v2202_v21, %v1764_v6  ;;  %v1049_v38 = vmul.f32 0.5, %v1048_v7 }
 0x4e1   :  { %v1771_v33 = vmul.f32 %v1769_v5, %v1768_v8  ;;  %v1772_v12 = vmul.f32 %v1770_v17, %v1768_v8 }
 0x4e2   :  { %v1050_v58 = vsub.f32 1.5, %v1049_v38 }
 0x4e3   :  { %v1778_v23 = vmul.f32 %v1774_v41, %v1771_v33  ;;  %v1779_v16 = vmul.f32 %v1775_v36, %v1772_v12 }
 0x4e4   :  { %v1051_v13 = vmul.f32 %v2204_v31, %v1050_v58 }
 0x4e5   :  { %v1785_v62 = vadd.f32 %v1781_v54, %v1778_v23  ;;  %v1786_v35 = vadd.f32 %v1782_v39, %v1779_v16 }
 0x4e6   :  { %v1055_v45 = vsel %vm1054_vm2, %v2204_v31, %v1051_v13 }
 0x4e7   :  { %v1058_v53 = vmul.f32 %v1056_v52, %v1055_v45  ;;  %v1059_v55 = vmul.f32 %v1057_v47, %v1055_v45  ;;  %v1787_v27 = vmax.f32 %v1785_v62, 0.0  ;;  %v1788_v42 = vmax.f32 %v1786_v35, 0.0 }
 0x4e9   :  { %1977 = vmatmul.f32.vlgmr.msra.gmra.mxu2 %v1787_v27  ;;  %1997 = vmatmul.f32.vlgmr.msra.gmra.mxu3 %v1788_v42  ;;  %v1065_v29 = vmul.f32 %v1061_v49, %v1058_v53  ;;  %v1066_v14 = vmul.f32 %v1062_v3, %v1059_v55 }
 0x4eb   :  { %v1072_v18 = vadd.f32 %v1068_v20, %v1065_v29  ;;  %v1073_v0 = vadd.f32 %v1069_v19, %v1066_v14 }
 0x4ed   :  { %v1074_v24 = vmax.f32 %v1072_v18, 0.0  ;;  %v1075_v61 = vmax.f32 %v1073_v0, 0.0 }
 0x4ef   :  { %1937 = vmatmul.f32.vlgmr.msra.gmra.mxu0 %v1074_v24  ;;  %1957 = vmatmul.f32.vlgmr.msra.gmra.mxu1 %v1075_v61 }
 0x56c   :  { %v1938_v2 = vpop.f32.mrf.mxu0  ;;  %v1958_v56 = vpop.f32.mrf.mxu1 }
 0x56d   :  { %v1939_v60 = vadd.f32 %v2192_v43, %v1938_v2  ;;  %v1978_v40 = vpop.f32.mrf.mxu2  ;;  %v1998_v37 = vpop.f32.mrf.mxu3 }
 0x56f   :  { %v1959_v11 = vadd.f32 %v1958_v56, %v1939_v60 }
 0x571   :  { %v1979_v1 = vadd.f32 %v1978_v40, %v1959_v11 }
 0x573   :  { %v1999_v46 = vadd.f32 %v1998_v37, %v1979_v1 }
 0x575   :  { %2001 = vst [vmem:[%s3175_s8] sm:$0xff] %v1999_v46 }
 0x576   :  { %2006 = vsyncpa [#allocation3], 1 }
 0x577   :  { %2007 = vsyncpa [#allocation5], 1 }
 0x578   :  { %2008 = vsyncpa [#allocation8], 1 }
 0x579   :  { %2009 = vsyncpa [#allocation11], 1 }
 0x57a   :  { %2010 = vsyncpa [#allocation14], 1 }

</bundles_post_ra>
